<compile_context>
chip_gen: v7x
topology: tpu7x:2x2x1
jax: 0.10.0
libtpu: 0.0.40
codegen_flags: <defaults>
</compile_context>

<pallas_src>
import functools
import math

import jax
import jax.numpy as jnp
from jax import lax
from jax.experimental import pallas as pl
from jax.experimental.pallas import tpu as pltpu

_PI = math.pi
_TWO_PI = 2.0 * math.pi
_DEG2RAD = math.pi / 180.0
_RAD2DEG = 180.0 / math.pi
_25_POW7 = 25.0 ** 7

_LC = 128             # lane tile
_MAX_BLOCK_ROWS = 1024  # max sublanes per grid step (1024*128 = 128K px/step)
_CHUNK_ROWS = 16      # sublanes per in-kernel compute chunk (vreg pressure)

# Precomputed reciprocal constants (fold EUP divides into VPU multiplies).
_INV_1055 = 1.0 / 1.055
_INV_1292 = 1.0 / 12.92
_INV_XN = 1.0 / 0.95047
_INV_ZN = 1.0 / 1.08883
_INV_116 = 1.0 / 116.0
_THIRD = 1.0 / 3.0
_INV_25 = 1.0 / 25.0

# Phase-offset constants for the multiple-angle T-term expansion.
_COS30, _SIN30 = math.cos(30.0 * _DEG2RAD), math.sin(30.0 * _DEG2RAD)
_COS6, _SIN6 = math.cos(6.0 * _DEG2RAD), math.sin(6.0 * _DEG2RAD)
_COS63, _SIN63 = math.cos(63.0 * _DEG2RAD), math.sin(63.0 * _DEG2RAD)


# ---------------- kernel-side elementwise math (EUP-trimmed) -----------------


def _fast_recip(x):
    # One approx EUP reciprocal + one Newton step on the VPU (free filler under
    # the EUP bound).  Post-Newton relative error ~ (approx err)^2 << 1e-7,
    # well inside the 1e-5 end-to-end tolerance.
    r = pl.reciprocal(x, approx=True)
    return r * (2.0 - x * r)


def _srgb_to_linear(c):
    # ((c + 0.055) / 1.055) ** 2.4 via exp/log; (c + 0.055) > 0 for c in [0,1].
    # TODO(synk): a VPU-only minimax polynomial here would cut ~12 EUP ops/pixel
    # but needs accuracy re-validation against the reference; kept exact.
    gamma = jnp.exp(2.4 * jnp.log((c + 0.055) * _INV_1055))
    return jnp.where(c > 0.04045, gamma, c * _INV_1292)


def _cbrt_pos(x):
    # x ** (1/3) for x >= 0; the x<=eps branch is masked by the caller's where.
    return jnp.exp(jnp.log(jnp.maximum(x, 1e-12)) * _THIRD)


def _rgb_to_lab(r, g, b):
    rl, gl, bl = _srgb_to_linear(r), _srgb_to_linear(g), _srgb_to_linear(b)
    x = 0.412453 * rl + 0.35758 * gl + 0.180423 * bl
    y = 0.212671 * rl + 0.71516 * gl + 0.072169 * bl
    z = 0.019334 * rl + 0.119193 * gl + 0.950227 * bl
    x = x * _INV_XN
    z = z * _INV_ZN
    eps = 0.008856
    kappa = 903.3

    def f(t):
        return jnp.where(t > eps, _cbrt_pos(t), (kappa * t + 16.0) * _INV_116)

    fx, fy, fz = f(x), f(y), f(z)
    L = 116.0 * fy - 16.0
    a = 500.0 * (fx - fy)
    bb = 200.0 * (fy - fz)
    return L, a, bb


def _cart2polar_2pi(x, y):
    # TODO(synk): a custom atan2 (approx recip + odd polynomial on the VPU)
    # could trim a few more EUP ops; kept jnp.arctan2 for accuracy.
    r = jnp.sqrt(x * x + y * y)
    t = jnp.arctan2(y, x)
    t = t + jnp.where(t < 0.0, _TWO_PI, 0.0)
    return r, t


def _delta_e_2000(L1, a1, b1, L2, a2, b2, kL=1.0, kC=1.0, kH=1.0):
    CBar = 0.5 * (jnp.sqrt(a1 * a1 + b1 * b1 + 1e-6) +
                  jnp.sqrt(a2 * a2 + b2 * b2 + 1e-6))
    c7 = CBar ** 7
    G = 0.5 * (1.0 - jnp.sqrt(c7 * _fast_recip(c7 + _25_POW7) + 1e-6))
    scale = 1.0 + G
    C1, h1 = _cart2polar_2pi(a1 * scale, b1)
    C2, h2 = _cart2polar_2pi(a2 * scale, b2)

    Lbar = 0.5 * (L1 + L2)
    tmp = (Lbar - 50.0) ** 2
    SL = 1.0 + 0.015 * tmp * lax.rsqrt(20.0 + tmp)
    L_term = (L2 - L1) * _fast_recip(kL * SL)

    Cbar = 0.5 * (C1 + C2)
    SC = 1.0 + 0.045 * Cbar
    C_term = (C2 - C1) * _fast_recip(kC * SC)

    h_diff = h2 - h1
    h_sum = h1 + h2
    CC = C1 * C2

    dH = h_diff
    dH = jnp.where(h_diff > _PI, dH - _TWO_PI, dH)
    dH = jnp.where(h_diff < -_PI, dH + _TWO_PI, dH)
    dH = jnp.where(CC == 0.0, 0.0, dH)
    dH_term = 2.0 * jnp.sqrt(CC + 1e-6) * jnp.sin(0.5 * dH)

    mask = (CC != 0.0) & (jnp.abs(h_diff) > _PI)
    Hbar = h_sum
    Hbar = jnp.where(mask & (h_sum < _TWO_PI), Hbar + _TWO_PI, Hbar)
    Hbar = jnp.where(mask & (h_sum >= _TWO_PI), Hbar - _TWO_PI, Hbar)
    Hbar = jnp.where(CC == 0.0, Hbar * 2.0, Hbar)
    Hbar = Hbar * 0.5

    # T via one cos + one sin; higher harmonics via multiple-angle identities
    # (cheap VPU filler under the EUP-bound bundle).
    cH = jnp.cos(Hbar)
    sH = jnp.sin(Hbar)
    cH2 = cH * cH
    sH2 = sH * sH
    cos2H = 2.0 * cH2 - 1.0
    sin2H = 2.0 * sH * cH
    cos3H = cH * (4.0 * cH2 - 3.0)
    sin3H = sH * (3.0 - 4.0 * sH2)
    cos4H = 2.0 * cos2H * cos2H - 1.0
    sin4H = 2.0 * sin2H * cos2H
    T = (1.0
         - 0.17 * (cH * _COS30 + sH * _SIN30)        # cos(H - 30deg)
         + 0.24 * cos2H                              # cos(2H)
         + 0.32 * (cos3H * _COS6 - sin3H * _SIN6)    # cos(3H + 6deg)
         - 0.2 * (cos4H * _COS63 + sin4H * _SIN63))  # cos(4H - 63deg)
    SH = 1.0 + 0.015 * Cbar * T
    H_term = dH_term * _fast_recip(kH * SH)

    c7 = Cbar ** 7
    Rc = 2.0 * jnp.sqrt(c7 * _fast_recip(c7 + _25_POW7) + 1e-6)
    dtheta = (30.0 * _DEG2RAD) * jnp.exp(
        -(((Hbar * _RAD2DEG) - 275.0) * _INV_25) ** 2)
    R_term = -jnp.sin(2.0 * dtheta) * Rc * C_term * H_term

    dE2 = L_term * L_term + C_term * C_term + H_term * H_term + R_term
    return jnp.sqrt(jnp.maximum(dE2, 0.0))


# ---------------- Pallas kernel ----------------------------------------------


def _color_loss_kernel(c1_ref, c2_ref, out_ref, *, n, block_rows, chunk_rows):
    # c1_ref/c2_ref: (3, block_rows, 128); out_ref: (8, 128) per-step partial.
    i = pl.program_id(0)
    base_row = i * block_rows
    n_chunks = block_rows // chunk_rows
    folds = chunk_rows // 8

    # Hoisted once per grid step (JAX does not CSE broadcast_in_dim): flat
    # pixel index within a chunk, row-major over (sublane, lane).
    pix_in_chunk = (lax.broadcasted_iota(jnp.int32, (chunk_rows, _LC), 0) * _LC
                    + lax.broadcasted_iota(jnp.int32, (chunk_rows, _LC), 1))

    def chunk_body(j, acc):
        off = pl.multiple_of(j * chunk_rows, chunk_rows)
        r1 = c1_ref[0, pl.ds(off, chunk_rows), :]
        g1 = c1_ref[1, pl.ds(off, chunk_rows), :]
        b1 = c1_ref[2, pl.ds(off, chunk_rows), :]
        r2 = c2_ref[0, pl.ds(off, chunk_rows), :]
        g2 = c2_ref[1, pl.ds(off, chunk_rows), :]
        b2 = c2_ref[2, pl.ds(off, chunk_rows), :]

        L1, A1, B1 = _rgb_to_lab(r1, g1, b1)
        L2, A2, B2 = _rgb_to_lab(r2, g2, b2)
        de = _delta_e_2000(L1, A1, B1, L2, A2, B2)

        # In-kernel tail mask (no mask input / HBM traffic).  `lim` is a scalar
        # per chunk; int32 math is safe because n_pad < 2**31 (wrapper assert).
        lim = n - (base_row + off) * _LC
        de = jnp.where(pix_in_chunk < lim, de, 0.0)

        # Fold (chunk_rows, 128) into the (8, 128) accumulator (plain VPU adds).
        for s in range(folds):
            acc = acc + de[s * 8:(s + 1) * 8, :]
        return acc

    acc = lax.fori_loop(0, n_chunks, chunk_body,
                        jnp.zeros((8, _LC), jnp.float32),
                        unroll=min(4, n_chunks))
    out_ref[...] = acc


def _pick_block_rows(n_pixels):
    """Largest power-of-two sublane block (<= _MAX_BLOCK_ROWS) that still gives
    >= 4 grid steps on large inputs (so v7x's two TensorCores both get work)
    while not grossly over-padding tiny inputs."""
    rows = max(1, -(-n_pixels // _LC))
    if rows <= 8:
        return 8
    target = rows // 4 if rows >= 32 else rows
    br = 8
    while br < _MAX_BLOCK_ROWS and br * 2 <= target:
        br *= 2
    return br


def _color_loss(color1, color2):
    """(delta_e_2000(rgb_to_lab(color1), rgb_to_lab(color2)) / 100).mean()"""
    assert color1.shape == color2.shape and color1.shape[-1] == 3
    c1 = color1.reshape(-1, 3).astype(jnp.float32)
    c2 = color2.reshape(-1, 3).astype(jnp.float32)
    n = c1.shape[0]

    block_rows = _pick_block_rows(n)
    chunk_rows = min(_CHUNK_ROWS, block_rows)
    block_pix = block_rows * _LC
    n_pad = ((n + block_pix - 1) // block_pix) * block_pix
    assert n_pad < 2 ** 31, "int32 tail-mask indexing limit"
    pad = n_pad - n
    R = n_pad // _LC
    num_blocks = R // block_rows

    # Channel-major, lane-dense planes (3, R, 128).  allow_input_fusion below
    # lets XLA fuse this transpose/pad into the pallas_call operand read (when
    # the whole loss is jitted) instead of materializing a second HBM copy.
    # TODO(synk): producing colors channel-major upstream removes it entirely.
    c1_planes = jnp.pad(c1.T, ((0, 0), (0, pad))).reshape(3, R, _LC)
    c2_planes = jnp.pad(c2.T, ((0, 0), (0, pad))).reshape(3, R, _LC)

    kernel = functools.partial(_color_loss_kernel, n=n,
                               block_rows=block_rows, chunk_rows=chunk_rows)

    cost = pl.CostEstimate(
        flops=int(300 * n_pad),
        transcendentals=int(48 * n_pad),
        bytes_accessed=int(24 * n_pad + 4 * 8 * _LC * num_blocks))

    partials = pl.pallas_call(
        kernel,
        out_shape=jax.ShapeDtypeStruct((num_blocks, 8, _LC), jnp.float32),
        grid=(num_blocks,),
        in_specs=[
            pl.BlockSpec((3, block_rows, _LC), lambda i: (0, i, 0)),
            pl.BlockSpec((3, block_rows, _LC), lambda i: (0, i, 0)),
        ],
        out_specs=pl.BlockSpec((None, 8, _LC), lambda i: (i, 0, 0)),
        compiler_params=pltpu.CompilerParams(
            dimension_semantics=("parallel",),
            allow_input_fusion=[True, True]),
        cost_estimate=cost,
    )(c1_planes, c2_planes)

    return jnp.sum(partials) / (n * 100.0)


# Jit the whole loss so the pad/transpose producers and the tiny final
# reduction get scheduled/fused around the pallas_call.
color_loss = jax.jit(_color_loss)


# ---------------- pure-JAX reference (mirrors the PyTorch module) ------------


def _rgb_to_lab_ref(rgb):
    lin = jnp.where(rgb > 0.04045, ((rgb + 0.055) / 1.055) ** 2.4, rgb / 12.92)
    M = jnp.array([[0.412453, 0.35758, 0.180423],
                   [0.212671, 0.71516, 0.072169],
                   [0.019334, 0.119193, 0.950227]], jnp.float32)
    xyz = lin @ M.T
    xyz = xyz / jnp.array([0.95047, 1.0, 1.08883], jnp.float32)
    eps, kappa = 0.008856, 903.3
    f = jnp.where(xyz > eps, xyz ** (1.0 / 3.0), (kappa * xyz + 16.0) / 116.0)
    L = 116.0 * f[..., 1] - 16.0
    a = 500.0 * (f[..., 0] - f[..., 1])
    b = 200.0 * (f[..., 1] - f[..., 2])
    return L, a, b


def _delta_e_2000_ref(L1, a1, b1, L2, a2, b2, kL=1.0, kC=1.0, kH=1.0):
    CBar = 0.5 * (jnp.sqrt(a1 ** 2 + b1 ** 2 + 1e-6) +
                  jnp.sqrt(a2 ** 2 + b2 ** 2 + 1e-6))
    c7 = CBar ** 7
    G = 0.5 * (1.0 - jnp.sqrt(c7 / (c7 + _25_POW7) + 1e-6))
    scale = 1.0 + G
    C1, h1 = _cart2polar_2pi(a1 * scale, b1)
    C2, h2 = _cart2polar_2pi(a2 * scale, b2)

    Lbar = 0.5 * (L1 + L2)
    tmp = (Lbar - 50.0) ** 2
    SL = 1.0 + 0.015 * tmp / jnp.sqrt(20.0 + tmp)
    L_term = (L2 - L1) / (kL * SL)

    Cbar = 0.5 * (C1 + C2)
    SC = 1.0 + 0.045 * Cbar
    C_term = (C2 - C1) / (kC * SC)

    h_diff = h2 - h1
    h_sum = h1 + h2
    CC = C1 * C2

    dH = h_diff
    dH = jnp.where(h_diff > _PI, dH - _TWO_PI, dH)
    dH = jnp.where(h_diff < -_PI, dH + _TWO_PI, dH)
    dH = jnp.where(CC == 0.0, 0.0, dH)
    dH_term = 2.0 * jnp.sqrt(CC + 1e-6) * jnp.sin(dH / 2.0)

    mask = (CC != 0.0) & (jnp.abs(h_diff) > _PI)
    Hbar = h_sum
    Hbar = jnp.where(mask & (h_sum < _TWO_PI), Hbar + _TWO_PI, Hbar)
    Hbar = jnp.where(mask & (h_sum >= _TWO_PI), Hbar - _TWO_PI, Hbar)
    Hbar = jnp.where(CC == 0.0, Hbar * 2.0, Hbar)
    Hbar = Hbar * 0.5

    T = (1.0
         - 0.17 * jnp.cos(Hbar - 30.0 * _DEG2RAD)
         + 0.24 * jnp.cos(2.0 * Hbar)
         + 0.32 * jnp.cos(3.0 * Hbar + 6.0 * _DEG2RAD)
         - 0.2 * jnp.cos(4.0 * Hbar - 63.0 * _DEG2RAD))
    SH = 1.0 + 0.015 * Cbar * T
    H_term = dH_term / (kH * SH)

    c7 = Cbar ** 7
    Rc = 2.0 * jnp.sqrt(c7 / (c7 + _25_POW7) + 1e-6)
    dtheta = (30.0 * _DEG2RAD) * jnp.exp(-(((Hbar * _RAD2DEG) - 275.0) / 25.0) ** 2)
    R_term = -jnp.sin(2.0 * dtheta) * Rc * C_term * H_term

    dE2 = L_term ** 2 + C_term ** 2 + H_term ** 2 + R_term
    return jnp.sqrt(jnp.maximum(dE2, 0.0))


def color_loss_ref(color1, color2):
    c1 = color1.reshape(-1, 3).astype(jnp.float32)
    c2 = color2.reshape(-1, 3).astype(jnp.float32)
    L1, A1, B1 = _rgb_to_lab_ref(c1)
    L2, A2, B2 = _rgb_to_lab_ref(c2)
    de = _delta_e_2000_ref(L1, A1, B1, L2, A2, B2)
    return jnp.mean(de / 100.0)


if __name__ == "__main__":
    key = jax.random.PRNGKey(0)
    k1, k2 = jax.random.split(key)
    # (..., 3) RGB in [0, 1]; e.g. batch=2, 8x16 spatial.
    color1 = jax.random.uniform(k1, (2, 8, 16, 3), dtype=jnp.float32)
    color2 = jax.random.uniform(k2, (2, 8, 16, 3), dtype=jnp.float32)

    loss = jax.block_until_ready(color_loss(color1, color2))
    ref = jax.block_until_ready(color_loss_ref(color1, color2))

    # TODO(synk): check_nan / check_negative runtime asserts from the PyTorch
    # module are debugging aids and are intentionally not replicated in-kernel.
    assert jnp.isfinite(loss), "loss is not finite"
    assert abs(float(loss) - float(ref)) < 1e-5, (float(loss), float(ref))
    print("KERNEL_OK")
</pallas_src>

<mosaic_0001>
module attributes {stable_mosaic.version = 11 : i64} {
  func.func @_color_loss_kernel(%arg0: i32, %arg1: memref<3x8x128xf32, #tpu.memory_space<vmem>>, %arg2: memref<3x8x128xf32, #tpu.memory_space<vmem>>, %arg3: memref<1x8x128xf32, #tpu.memory_space<vmem>>) attributes {dimension_semantics = [#tpu.dimension_semantics<parallel>], iteration_bounds = array<i64: 1>, scalar_prefetch = 0 : i64, scratch_operands = 0 : i64, tpu.core_type = #tpu.core_type<tc>, window_params = [{transform_indices = @transform_0, window_bounds = array<i64: 3, 8, 128>}, {transform_indices = @transform_1, window_bounds = array<i64: 3, 8, 128>}, {transform_indices = @transform_2, window_bounds = array<i64: 1, 8, 128>}]} {
    %c8_i32 = arith.constant 8 : i32
    %0 = arith.muli %arg0, %c8_i32 : i32
    %1 = tpu.iota {dimensions = array<i32: 0>} : vector<8x128xi32>
    %c128_i32 = arith.constant 128 : i32
    %2 = vector.broadcast %c128_i32 : i32 to vector<8x128xi32>
    %3 = arith.muli %1, %2 : vector<8x128xi32>
    %4 = tpu.iota {dimensions = array<i32: 1>} : vector<8x128xi32>
    %5 = arith.addi %3, %4 : vector<8x128xi32>
    %cst = arith.constant 0.000000e+00 : f32
    %6 = vector.broadcast %cst : f32 to vector<8x128xf32>
    %c0_i32 = arith.constant 0 : i32
    %c8_i32_0 = arith.constant 8 : i32
    %7 = arith.muli %c0_i32, %c8_i32_0 : i32
    %8 = tpu.assume_multiple %7, 8 : i32
    %c0 = arith.constant 0 : index
    %9 = arith.index_cast %8 : i32 to index
    %c0_1 = arith.constant 0 : index
    %10 = vector.load %arg1[%c0, %9, %c0_1] : memref<3x8x128xf32, #tpu.memory_space<vmem>>, vector<1x8x128xf32>
    %11 = vector.shape_cast %10 : vector<1x8x128xf32> to vector<8x128xf32>
    %c1 = arith.constant 1 : index
    %12 = arith.index_cast %8 : i32 to index
    %c0_2 = arith.constant 0 : index
    %13 = vector.load %arg1[%c1, %12, %c0_2] : memref<3x8x128xf32, #tpu.memory_space<vmem>>, vector<1x8x128xf32>
    %14 = vector.shape_cast %13 : vector<1x8x128xf32> to vector<8x128xf32>
    %c2 = arith.constant 2 : index
    %15 = arith.index_cast %8 : i32 to index
    %c0_3 = arith.constant 0 : index
    %16 = vector.load %arg1[%c2, %15, %c0_3] : memref<3x8x128xf32, #tpu.memory_space<vmem>>, vector<1x8x128xf32>
    %17 = vector.shape_cast %16 : vector<1x8x128xf32> to vector<8x128xf32>
    %c0_4 = arith.constant 0 : index
    %18 = arith.index_cast %8 : i32 to index
    %c0_5 = arith.constant 0 : index
    %19 = vector.load %arg2[%c0_4, %18, %c0_5] : memref<3x8x128xf32, #tpu.memory_space<vmem>>, vector<1x8x128xf32>
    %20 = vector.shape_cast %19 : vector<1x8x128xf32> to vector<8x128xf32>
    %c1_6 = arith.constant 1 : index
    %21 = arith.index_cast %8 : i32 to index
    %c0_7 = arith.constant 0 : index
    %22 = vector.load %arg2[%c1_6, %21, %c0_7] : memref<3x8x128xf32, #tpu.memory_space<vmem>>, vector<1x8x128xf32>
    %23 = vector.shape_cast %22 : vector<1x8x128xf32> to vector<8x128xf32>
    %c2_8 = arith.constant 2 : index
    %24 = arith.index_cast %8 : i32 to index
    %c0_9 = arith.constant 0 : index
    %25 = vector.load %arg2[%c2_8, %24, %c0_9] : memref<3x8x128xf32, #tpu.memory_space<vmem>>, vector<1x8x128xf32>
    %26 = vector.shape_cast %25 : vector<1x8x128xf32> to vector<8x128xf32>
    %cst_10 = arith.constant 5.500000e-02 : f32
    %27 = vector.broadcast %cst_10 : f32 to vector<8x128xf32>
    %28 = arith.addf %11, %27 : vector<8x128xf32>
    %cst_11 = arith.constant 0.947867274 : f32
    %29 = vector.broadcast %cst_11 : f32 to vector<8x128xf32>
    %30 = arith.mulf %28, %29 : vector<8x128xf32>
    %31 = math.log %30 : vector<8x128xf32>
    %cst_12 = arith.constant 2.400000e+00 : f32
    %32 = vector.broadcast %cst_12 : f32 to vector<8x128xf32>
    %33 = arith.mulf %32, %31 : vector<8x128xf32>
    %34 = math.exp %33 : vector<8x128xf32>
    %cst_13 = arith.constant 4.045000e-02 : f32
    %35 = vector.broadcast %cst_13 : f32 to vector<8x128xf32>
    %36 = arith.cmpf ogt, %11, %35 : vector<8x128xf32>
    %cst_14 = arith.constant 0.0773993805 : f32
    %37 = vector.broadcast %cst_14 : f32 to vector<8x128xf32>
    %38 = arith.mulf %11, %37 : vector<8x128xf32>
    %39 = arith.select %36, %34, %38 : vector<8x128xi1>, vector<8x128xf32>
    %cst_15 = arith.constant 5.500000e-02 : f32
    %40 = vector.broadcast %cst_15 : f32 to vector<8x128xf32>
    %41 = arith.addf %14, %40 : vector<8x128xf32>
    %cst_16 = arith.constant 0.947867274 : f32
    %42 = vector.broadcast %cst_16 : f32 to vector<8x128xf32>
    %43 = arith.mulf %41, %42 : vector<8x128xf32>
    %44 = math.log %43 : vector<8x128xf32>
    %cst_17 = arith.constant 2.400000e+00 : f32
    %45 = vector.broadcast %cst_17 : f32 to vector<8x128xf32>
    %46 = arith.mulf %45, %44 : vector<8x128xf32>
    %47 = math.exp %46 : vector<8x128xf32>
    %cst_18 = arith.constant 4.045000e-02 : f32
    %48 = vector.broadcast %cst_18 : f32 to vector<8x128xf32>
    %49 = arith.cmpf ogt, %14, %48 : vector<8x128xf32>
    %cst_19 = arith.constant 0.0773993805 : f32
    %50 = vector.broadcast %cst_19 : f32 to vector<8x128xf32>
    %51 = arith.mulf %14, %50 : vector<8x128xf32>
    %52 = arith.select %49, %47, %51 : vector<8x128xi1>, vector<8x128xf32>
    %cst_20 = arith.constant 5.500000e-02 : f32
    %53 = vector.broadcast %cst_20 : f32 to vector<8x128xf32>
    %54 = arith.addf %17, %53 : vector<8x128xf32>
    %cst_21 = arith.constant 0.947867274 : f32
    %55 = vector.broadcast %cst_21 : f32 to vector<8x128xf32>
    %56 = arith.mulf %54, %55 : vector<8x128xf32>
    %57 = math.log %56 : vector<8x128xf32>
    %cst_22 = arith.constant 2.400000e+00 : f32
    %58 = vector.broadcast %cst_22 : f32 to vector<8x128xf32>
    %59 = arith.mulf %58, %57 : vector<8x128xf32>
    %60 = math.exp %59 : vector<8x128xf32>
    %cst_23 = arith.constant 4.045000e-02 : f32
    %61 = vector.broadcast %cst_23 : f32 to vector<8x128xf32>
    %62 = arith.cmpf ogt, %17, %61 : vector<8x128xf32>
    %cst_24 = arith.constant 0.0773993805 : f32
    %63 = vector.broadcast %cst_24 : f32 to vector<8x128xf32>
    %64 = arith.mulf %17, %63 : vector<8x128xf32>
    %65 = arith.select %62, %60, %64 : vector<8x128xi1>, vector<8x128xf32>
    %cst_25 = arith.constant 4.124530e-01 : f32
    %66 = vector.broadcast %cst_25 : f32 to vector<8x128xf32>
    %67 = arith.mulf %66, %39 : vector<8x128xf32>
    %cst_26 = arith.constant 3.575800e-01 : f32
    %68 = vector.broadcast %cst_26 : f32 to vector<8x128xf32>
    %69 = arith.mulf %68, %52 : vector<8x128xf32>
    %70 = arith.addf %67, %69 : vector<8x128xf32>
    %cst_27 = arith.constant 1.804230e-01 : f32
    %71 = vector.broadcast %cst_27 : f32 to vector<8x128xf32>
    %72 = arith.mulf %71, %65 : vector<8x128xf32>
    %73 = arith.addf %70, %72 : vector<8x128xf32>
    %cst_28 = arith.constant 2.126710e-01 : f32
    %74 = vector.broadcast %cst_28 : f32 to vector<8x128xf32>
    %75 = arith.mulf %74, %39 : vector<8x128xf32>
    %cst_29 = arith.constant 7.151600e-01 : f32
    %76 = vector.broadcast %cst_29 : f32 to vector<8x128xf32>
    %77 = arith.mulf %76, %52 : vector<8x128xf32>
    %78 = arith.addf %75, %77 : vector<8x128xf32>
    %cst_30 = arith.constant 7.216900e-02 : f32
    %79 = vector.broadcast %cst_30 : f32 to vector<8x128xf32>
    %80 = arith.mulf %79, %65 : vector<8x128xf32>
    %81 = arith.addf %78, %80 : vector<8x128xf32>
    %cst_31 = arith.constant 1.933400e-02 : f32
    %82 = vector.broadcast %cst_31 : f32 to vector<8x128xf32>
    %83 = arith.mulf %82, %39 : vector<8x128xf32>
    %cst_32 = arith.constant 1.191930e-01 : f32
    %84 = vector.broadcast %cst_32 : f32 to vector<8x128xf32>
    %85 = arith.mulf %84, %52 : vector<8x128xf32>
    %86 = arith.addf %83, %85 : vector<8x128xf32>
    %cst_33 = arith.constant 9.502270e-01 : f32
    %87 = vector.broadcast %cst_33 : f32 to vector<8x128xf32>
    %88 = arith.mulf %87, %65 : vector<8x128xf32>
    %89 = arith.addf %86, %88 : vector<8x128xf32>
    %cst_34 = arith.constant 1.05211103 : f32
    %90 = vector.broadcast %cst_34 : f32 to vector<8x128xf32>
    %91 = arith.mulf %73, %90 : vector<8x128xf32>
    %cst_35 = arith.constant 0.918417036 : f32
    %92 = vector.broadcast %cst_35 : f32 to vector<8x128xf32>
    %93 = arith.mulf %89, %92 : vector<8x128xf32>
    %cst_36 = arith.constant 8.856000e-03 : f32
    %94 = vector.broadcast %cst_36 : f32 to vector<8x128xf32>
    %95 = arith.cmpf ogt, %91, %94 : vector<8x128xf32>
    %cst_37 = arith.constant 9.99999996E-13 : f32
    %96 = vector.broadcast %cst_37 : f32 to vector<8x128xf32>
    %97 = arith.maximumf %91, %96 : vector<8x128xf32>
    %98 = math.log %97 : vector<8x128xf32>
    %cst_38 = arith.constant 0.333333343 : f32
    %99 = vector.broadcast %cst_38 : f32 to vector<8x128xf32>
    %100 = arith.mulf %98, %99 : vector<8x128xf32>
    %101 = math.exp %100 : vector<8x128xf32>
    %cst_39 = arith.constant 903.299987 : f32
    %102 = vector.broadcast %cst_39 : f32 to vector<8x128xf32>
    %103 = arith.mulf %102, %91 : vector<8x128xf32>
    %cst_40 = arith.constant 1.600000e+01 : f32
    %104 = vector.broadcast %cst_40 : f32 to vector<8x128xf32>
    %105 = arith.addf %103, %104 : vector<8x128xf32>
    %cst_41 = arith.constant 8.620690e-03 : f32
    %106 = vector.broadcast %cst_41 : f32 to vector<8x128xf32>
    %107 = arith.mulf %105, %106 : vector<8x128xf32>
    %108 = arith.select %95, %101, %107 : vector<8x128xi1>, vector<8x128xf32>
    %cst_42 = arith.constant 8.856000e-03 : f32
    %109 = vector.broadcast %cst_42 : f32 to vector<8x128xf32>
    %110 = arith.cmpf ogt, %81, %109 : vector<8x128xf32>
    %cst_43 = arith.constant 9.99999996E-13 : f32
    %111 = vector.broadcast %cst_43 : f32 to vector<8x128xf32>
    %112 = arith.maximumf %81, %111 : vector<8x128xf32>
    %113 = math.log %112 : vector<8x128xf32>
    %cst_44 = arith.constant 0.333333343 : f32
    %114 = vector.broadcast %cst_44 : f32 to vector<8x128xf32>
    %115 = arith.mulf %113, %114 : vector<8x128xf32>
    %116 = math.exp %115 : vector<8x128xf32>
    %cst_45 = arith.constant 903.299987 : f32
    %117 = vector.broadcast %cst_45 : f32 to vector<8x128xf32>
    %118 = arith.mulf %117, %81 : vector<8x128xf32>
    %cst_46 = arith.constant 1.600000e+01 : f32
    %119 = vector.broadcast %cst_46 : f32 to vector<8x128xf32>
    %120 = arith.addf %118, %119 : vector<8x128xf32>
    %cst_47 = arith.constant 8.620690e-03 : f32
    %121 = vector.broadcast %cst_47 : f32 to vector<8x128xf32>
    %122 = arith.mulf %120, %121 : vector<8x128xf32>
    %123 = arith.select %110, %116, %122 : vector<8x128xi1>, vector<8x128xf32>
    %cst_48 = arith.constant 8.856000e-03 : f32
    %124 = vector.broadcast %cst_48 : f32 to vector<8x128xf32>
    %125 = arith.cmpf ogt, %93, %124 : vector<8x128xf32>
    %cst_49 = arith.constant 9.99999996E-13 : f32
    %126 = vector.broadcast %cst_49 : f32 to vector<8x128xf32>
    %127 = arith.maximumf %93, %126 : vector<8x128xf32>
    %128 = math.log %127 : vector<8x128xf32>
    %cst_50 = arith.constant 0.333333343 : f32
    %129 = vector.broadcast %cst_50 : f32 to vector<8x128xf32>
    %130 = arith.mulf %128, %129 : vector<8x128xf32>
    %131 = math.exp %130 : vector<8x128xf32>
    %cst_51 = arith.constant 903.299987 : f32
    %132 = vector.broadcast %cst_51 : f32 to vector<8x128xf32>
    %133 = arith.mulf %132, %93 : vector<8x128xf32>
    %cst_52 = arith.constant 1.600000e+01 : f32
    %134 = vector.broadcast %cst_52 : f32 to vector<8x128xf32>
    %135 = arith.addf %133, %134 : vector<8x128xf32>
    %cst_53 = arith.constant 8.620690e-03 : f32
    %136 = vector.broadcast %cst_53 : f32 to vector<8x128xf32>
    %137 = arith.mulf %135, %136 : vector<8x128xf32>
    %138 = arith.select %125, %131, %137 : vector<8x128xi1>, vector<8x128xf32>
    %cst_54 = arith.constant 1.160000e+02 : f32
    %139 = vector.broadcast %cst_54 : f32 to vector<8x128xf32>
    %140 = arith.mulf %139, %123 : vector<8x128xf32>
    %cst_55 = arith.constant 1.600000e+01 : f32
    %141 = vector.broadcast %cst_55 : f32 to vector<8x128xf32>
    %142 = arith.subf %140, %141 : vector<8x128xf32>
    %143 = arith.subf %108, %123 : vector<8x128xf32>
    %cst_56 = arith.constant 5.000000e+02 : f32
    %144 = vector.broadcast %cst_56 : f32 to vector<8x128xf32>
    %145 = arith.mulf %144, %143 : vector<8x128xf32>
    %146 = arith.subf %123, %138 : vector<8x128xf32>
    %cst_57 = arith.constant 2.000000e+02 : f32
    %147 = vector.broadcast %cst_57 : f32 to vector<8x128xf32>
    %148 = arith.mulf %147, %146 : vector<8x128xf32>
    %cst_58 = arith.constant 5.500000e-02 : f32
    %149 = vector.broadcast %cst_58 : f32 to vector<8x128xf32>
    %150 = arith.addf %20, %149 : vector<8x128xf32>
    %cst_59 = arith.constant 0.947867274 : f32
    %151 = vector.broadcast %cst_59 : f32 to vector<8x128xf32>
    %152 = arith.mulf %150, %151 : vector<8x128xf32>
    %153 = math.log %152 : vector<8x128xf32>
    %cst_60 = arith.constant 2.400000e+00 : f32
    %154 = vector.broadcast %cst_60 : f32 to vector<8x128xf32>
    %155 = arith.mulf %154, %153 : vector<8x128xf32>
    %156 = math.exp %155 : vector<8x128xf32>
    %cst_61 = arith.constant 4.045000e-02 : f32
    %157 = vector.broadcast %cst_61 : f32 to vector<8x128xf32>
    %158 = arith.cmpf ogt, %20, %157 : vector<8x128xf32>
    %cst_62 = arith.constant 0.0773993805 : f32
    %159 = vector.broadcast %cst_62 : f32 to vector<8x128xf32>
    %160 = arith.mulf %20, %159 : vector<8x128xf32>
    %161 = arith.select %158, %156, %160 : vector<8x128xi1>, vector<8x128xf32>
    %cst_63 = arith.constant 5.500000e-02 : f32
    %162 = vector.broadcast %cst_63 : f32 to vector<8x128xf32>
    %163 = arith.addf %23, %162 : vector<8x128xf32>
    %cst_64 = arith.constant 0.947867274 : f32
    %164 = vector.broadcast %cst_64 : f32 to vector<8x128xf32>
    %165 = arith.mulf %163, %164 : vector<8x128xf32>
    %166 = math.log %165 : vector<8x128xf32>
    %cst_65 = arith.constant 2.400000e+00 : f32
    %167 = vector.broadcast %cst_65 : f32 to vector<8x128xf32>
    %168 = arith.mulf %167, %166 : vector<8x128xf32>
    %169 = math.exp %168 : vector<8x128xf32>
    %cst_66 = arith.constant 4.045000e-02 : f32
    %170 = vector.broadcast %cst_66 : f32 to vector<8x128xf32>
    %171 = arith.cmpf ogt, %23, %170 : vector<8x128xf32>
    %cst_67 = arith.constant 0.0773993805 : f32
    %172 = vector.broadcast %cst_67 : f32 to vector<8x128xf32>
    %173 = arith.mulf %23, %172 : vector<8x128xf32>
    %174 = arith.select %171, %169, %173 : vector<8x128xi1>, vector<8x128xf32>
    %cst_68 = arith.constant 5.500000e-02 : f32
    %175 = vector.broadcast %cst_68 : f32 to vector<8x128xf32>
    %176 = arith.addf %26, %175 : vector<8x128xf32>
    %cst_69 = arith.constant 0.947867274 : f32
    %177 = vector.broadcast %cst_69 : f32 to vector<8x128xf32>
    %178 = arith.mulf %176, %177 : vector<8x128xf32>
    %179 = math.log %178 : vector<8x128xf32>
    %cst_70 = arith.constant 2.400000e+00 : f32
    %180 = vector.broadcast %cst_70 : f32 to vector<8x128xf32>
    %181 = arith.mulf %180, %179 : vector<8x128xf32>
    %182 = math.exp %181 : vector<8x128xf32>
    %cst_71 = arith.constant 4.045000e-02 : f32
    %183 = vector.broadcast %cst_71 : f32 to vector<8x128xf32>
    %184 = arith.cmpf ogt, %26, %183 : vector<8x128xf32>
    %cst_72 = arith.constant 0.0773993805 : f32
    %185 = vector.broadcast %cst_72 : f32 to vector<8x128xf32>
    %186 = arith.mulf %26, %185 : vector<8x128xf32>
    %187 = arith.select %184, %182, %186 : vector<8x128xi1>, vector<8x128xf32>
    %cst_73 = arith.constant 4.124530e-01 : f32
    %188 = vector.broadcast %cst_73 : f32 to vector<8x128xf32>
    %189 = arith.mulf %188, %161 : vector<8x128xf32>
    %cst_74 = arith.constant 3.575800e-01 : f32
    %190 = vector.broadcast %cst_74 : f32 to vector<8x128xf32>
    %191 = arith.mulf %190, %174 : vector<8x128xf32>
    %192 = arith.addf %189, %191 : vector<8x128xf32>
    %cst_75 = arith.constant 1.804230e-01 : f32
    %193 = vector.broadcast %cst_75 : f32 to vector<8x128xf32>
    %194 = arith.mulf %193, %187 : vector<8x128xf32>
    %195 = arith.addf %192, %194 : vector<8x128xf32>
    %cst_76 = arith.constant 2.126710e-01 : f32
    %196 = vector.broadcast %cst_76 : f32 to vector<8x128xf32>
    %197 = arith.mulf %196, %161 : vector<8x128xf32>
    %cst_77 = arith.constant 7.151600e-01 : f32
    %198 = vector.broadcast %cst_77 : f32 to vector<8x128xf32>
    %199 = arith.mulf %198, %174 : vector<8x128xf32>
    %200 = arith.addf %197, %199 : vector<8x128xf32>
    %cst_78 = arith.constant 7.216900e-02 : f32
    %201 = vector.broadcast %cst_78 : f32 to vector<8x128xf32>
    %202 = arith.mulf %201, %187 : vector<8x128xf32>
    %203 = arith.addf %200, %202 : vector<8x128xf32>
    %cst_79 = arith.constant 1.933400e-02 : f32
    %204 = vector.broadcast %cst_79 : f32 to vector<8x128xf32>
    %205 = arith.mulf %204, %161 : vector<8x128xf32>
    %cst_80 = arith.constant 1.191930e-01 : f32
    %206 = vector.broadcast %cst_80 : f32 to vector<8x128xf32>
    %207 = arith.mulf %206, %174 : vector<8x128xf32>
    %208 = arith.addf %205, %207 : vector<8x128xf32>
    %cst_81 = arith.constant 9.502270e-01 : f32
    %209 = vector.broadcast %cst_81 : f32 to vector<8x128xf32>
    %210 = arith.mulf %209, %187 : vector<8x128xf32>
    %211 = arith.addf %208, %210 : vector<8x128xf32>
    %cst_82 = arith.constant 1.05211103 : f32
    %212 = vector.broadcast %cst_82 : f32 to vector<8x128xf32>
    %213 = arith.mulf %195, %212 : vector<8x128xf32>
    %cst_83 = arith.constant 0.918417036 : f32
    %214 = vector.broadcast %cst_83 : f32 to vector<8x128xf32>
    %215 = arith.mulf %211, %214 : vector<8x128xf32>
    %cst_84 = arith.constant 8.856000e-03 : f32
    %216 = vector.broadcast %cst_84 : f32 to vector<8x128xf32>
    %217 = arith.cmpf ogt, %213, %216 : vector<8x128xf32>
    %cst_85 = arith.constant 9.99999996E-13 : f32
    %218 = vector.broadcast %cst_85 : f32 to vector<8x128xf32>
    %219 = arith.maximumf %213, %218 : vector<8x128xf32>
    %220 = math.log %219 : vector<8x128xf32>
    %cst_86 = arith.constant 0.333333343 : f32
    %221 = vector.broadcast %cst_86 : f32 to vector<8x128xf32>
    %222 = arith.mulf %220, %221 : vector<8x128xf32>
    %223 = math.exp %222 : vector<8x128xf32>
    %cst_87 = arith.constant 903.299987 : f32
    %224 = vector.broadcast %cst_87 : f32 to vector<8x128xf32>
    %225 = arith.mulf %224, %213 : vector<8x128xf32>
    %cst_88 = arith.constant 1.600000e+01 : f32
    %226 = vector.broadcast %cst_88 : f32 to vector<8x128xf32>
    %227 = arith.addf %225, %226 : vector<8x128xf32>
    %cst_89 = arith.constant 8.620690e-03 : f32
    %228 = vector.broadcast %cst_89 : f32 to vector<8x128xf32>
    %229 = arith.mulf %227, %228 : vector<8x128xf32>
    %230 = arith.select %217, %223, %229 : vector<8x128xi1>, vector<8x128xf32>
    %cst_90 = arith.constant 8.856000e-03 : f32
    %231 = vector.broadcast %cst_90 : f32 to vector<8x128xf32>
    %232 = arith.cmpf ogt, %203, %231 : vector<8x128xf32>
    %cst_91 = arith.constant 9.99999996E-13 : f32
    %233 = vector.broadcast %cst_91 : f32 to vector<8x128xf32>
    %234 = arith.maximumf %203, %233 : vector<8x128xf32>
    %235 = math.log %234 : vector<8x128xf32>
    %cst_92 = arith.constant 0.333333343 : f32
    %236 = vector.broadcast %cst_92 : f32 to vector<8x128xf32>
    %237 = arith.mulf %235, %236 : vector<8x128xf32>
    %238 = math.exp %237 : vector<8x128xf32>
    %cst_93 = arith.constant 903.299987 : f32
    %239 = vector.broadcast %cst_93 : f32 to vector<8x128xf32>
    %240 = arith.mulf %239, %203 : vector<8x128xf32>
    %cst_94 = arith.constant 1.600000e+01 : f32
    %241 = vector.broadcast %cst_94 : f32 to vector<8x128xf32>
    %242 = arith.addf %240, %241 : vector<8x128xf32>
    %cst_95 = arith.constant 8.620690e-03 : f32
    %243 = vector.broadcast %cst_95 : f32 to vector<8x128xf32>
    %244 = arith.mulf %242, %243 : vector<8x128xf32>
    %245 = arith.select %232, %238, %244 : vector<8x128xi1>, vector<8x128xf32>
    %cst_96 = arith.constant 8.856000e-03 : f32
    %246 = vector.broadcast %cst_96 : f32 to vector<8x128xf32>
    %247 = arith.cmpf ogt, %215, %246 : vector<8x128xf32>
    %cst_97 = arith.constant 9.99999996E-13 : f32
    %248 = vector.broadcast %cst_97 : f32 to vector<8x128xf32>
    %249 = arith.maximumf %215, %248 : vector<8x128xf32>
    %250 = math.log %249 : vector<8x128xf32>
    %cst_98 = arith.constant 0.333333343 : f32
    %251 = vector.broadcast %cst_98 : f32 to vector<8x128xf32>
    %252 = arith.mulf %250, %251 : vector<8x128xf32>
    %253 = math.exp %252 : vector<8x128xf32>
    %cst_99 = arith.constant 903.299987 : f32
    %254 = vector.broadcast %cst_99 : f32 to vector<8x128xf32>
    %255 = arith.mulf %254, %215 : vector<8x128xf32>
    %cst_100 = arith.constant 1.600000e+01 : f32
    %256 = vector.broadcast %cst_100 : f32 to vector<8x128xf32>
    %257 = arith.addf %255, %256 : vector<8x128xf32>
    %cst_101 = arith.constant 8.620690e-03 : f32
    %258 = vector.broadcast %cst_101 : f32 to vector<8x128xf32>
    %259 = arith.mulf %257, %258 : vector<8x128xf32>
    %260 = arith.select %247, %253, %259 : vector<8x128xi1>, vector<8x128xf32>
    %cst_102 = arith.constant 1.160000e+02 : f32
    %261 = vector.broadcast %cst_102 : f32 to vector<8x128xf32>
    %262 = arith.mulf %261, %245 : vector<8x128xf32>
    %cst_103 = arith.constant 1.600000e+01 : f32
    %263 = vector.broadcast %cst_103 : f32 to vector<8x128xf32>
    %264 = arith.subf %262, %263 : vector<8x128xf32>
    %265 = arith.subf %230, %245 : vector<8x128xf32>
    %cst_104 = arith.constant 5.000000e+02 : f32
    %266 = vector.broadcast %cst_104 : f32 to vector<8x128xf32>
    %267 = arith.mulf %266, %265 : vector<8x128xf32>
    %268 = arith.subf %245, %260 : vector<8x128xf32>
    %cst_105 = arith.constant 2.000000e+02 : f32
    %269 = vector.broadcast %cst_105 : f32 to vector<8x128xf32>
    %270 = arith.mulf %269, %268 : vector<8x128xf32>
    %271 = arith.mulf %145, %145 : vector<8x128xf32>
    %272 = arith.mulf %148, %148 : vector<8x128xf32>
    %273 = arith.addf %271, %272 : vector<8x128xf32>
    %cst_106 = arith.constant 9.99999997E-7 : f32
    %274 = vector.broadcast %cst_106 : f32 to vector<8x128xf32>
    %275 = arith.addf %273, %274 : vector<8x128xf32>
    %276 = math.sqrt %275 : vector<8x128xf32>
    %277 = arith.mulf %267, %267 : vector<8x128xf32>
    %278 = arith.mulf %270, %270 : vector<8x128xf32>
    %279 = arith.addf %277, %278 : vector<8x128xf32>
    %cst_107 = arith.constant 9.99999997E-7 : f32
    %280 = vector.broadcast %cst_107 : f32 to vector<8x128xf32>
    %281 = arith.addf %279, %280 : vector<8x128xf32>
    %282 = math.sqrt %281 : vector<8x128xf32>
    %283 = arith.addf %276, %282 : vector<8x128xf32>
    %cst_108 = arith.constant 5.000000e-01 : f32
    %284 = vector.broadcast %cst_108 : f32 to vector<8x128xf32>
    %285 = arith.mulf %284, %283 : vector<8x128xf32>
    %286 = arith.mulf %285, %285 : vector<8x128xf32>
    %287 = arith.mulf %285, %286 : vector<8x128xf32>
    %288 = arith.mulf %286, %286 : vector<8x128xf32>
    %289 = arith.mulf %287, %288 : vector<8x128xf32>
    %cst_109 = arith.constant 6.10351565E+9 : f32
    %290 = vector.broadcast %cst_109 : f32 to vector<8x128xf32>
    %291 = arith.addf %289, %290 : vector<8x128xf32>
    %292 = tpu.reciprocal %291 {approx = true} : vector<8x128xf32> -> vector<8x128xf32>
    %293 = arith.mulf %291, %292 : vector<8x128xf32>
    %cst_110 = arith.constant 2.000000e+00 : f32
    %294 = vector.broadcast %cst_110 : f32 to vector<8x128xf32>
    %295 = arith.subf %294, %293 : vector<8x128xf32>
    %296 = arith.mulf %292, %295 : vector<8x128xf32>
    %297 = arith.mulf %289, %296 : vector<8x128xf32>
    %cst_111 = arith.constant 9.99999997E-7 : f32
    %298 = vector.broadcast %cst_111 : f32 to vector<8x128xf32>
    %299 = arith.addf %297, %298 : vector<8x128xf32>
    %300 = math.sqrt %299 : vector<8x128xf32>
    %cst_112 = arith.constant 1.000000e+00 : f32
    %301 = vector.broadcast %cst_112 : f32 to vector<8x128xf32>
    %302 = arith.subf %301, %300 : vector<8x128xf32>
    %cst_113 = arith.constant 5.000000e-01 : f32
    %303 = vector.broadcast %cst_113 : f32 to vector<8x128xf32>
    %304 = arith.mulf %303, %302 : vector<8x128xf32>
    %cst_114 = arith.constant 1.000000e+00 : f32
    %305 = vector.broadcast %cst_114 : f32 to vector<8x128xf32>
    %306 = arith.addf %305, %304 : vector<8x128xf32>
    %307 = arith.mulf %145, %306 : vector<8x128xf32>
    %308 = arith.mulf %307, %307 : vector<8x128xf32>
    %309 = arith.mulf %148, %148 : vector<8x128xf32>
    %310 = arith.addf %308, %309 : vector<8x128xf32>
    %311 = math.sqrt %310 : vector<8x128xf32>
    %312 = math.atan2 %148, %307 : vector<8x128xf32>
    %cst_115 = arith.constant 0.000000e+00 : f32
    %313 = vector.broadcast %cst_115 : f32 to vector<8x128xf32>
    %314 = arith.cmpf olt, %312, %313 : vector<8x128xf32>
    %cst_116 = arith.constant 6.28318548 : f32
    %cst_117 = arith.constant 0.000000e+00 : f32
    %315 = vector.broadcast %cst_116 : f32 to vector<8x128xf32>
    %316 = vector.broadcast %cst_117 : f32 to vector<8x128xf32>
    %317 = arith.select %314, %315, %316 : vector<8x128xi1>, vector<8x128xf32>
    %318 = arith.addf %312, %317 : vector<8x128xf32>
    %319 = arith.mulf %267, %306 : vector<8x128xf32>
    %320 = arith.mulf %319, %319 : vector<8x128xf32>
    %321 = arith.mulf %270, %270 : vector<8x128xf32>
    %322 = arith.addf %320, %321 : vector<8x128xf32>
    %323 = math.sqrt %322 : vector<8x128xf32>
    %324 = math.atan2 %270, %319 : vector<8x128xf32>
    %cst_118 = arith.constant 0.000000e+00 : f32
    %325 = vector.broadcast %cst_118 : f32 to vector<8x128xf32>
    %326 = arith.cmpf olt, %324, %325 : vector<8x128xf32>
    %cst_119 = arith.constant 6.28318548 : f32
    %cst_120 = arith.constant 0.000000e+00 : f32
    %327 = vector.broadcast %cst_119 : f32 to vector<8x128xf32>
    %328 = vector.broadcast %cst_120 : f32 to vector<8x128xf32>
    %329 = arith.select %326, %327, %328 : vector<8x128xi1>, vector<8x128xf32>
    %330 = arith.addf %324, %329 : vector<8x128xf32>
    %331 = arith.addf %142, %264 : vector<8x128xf32>
    %cst_121 = arith.constant 5.000000e-01 : f32
    %332 = vector.broadcast %cst_121 : f32 to vector<8x128xf32>
    %333 = arith.mulf %332, %331 : vector<8x128xf32>
    %cst_122 = arith.constant 5.000000e+01 : f32
    %334 = vector.broadcast %cst_122 : f32 to vector<8x128xf32>
    %335 = arith.subf %333, %334 : vector<8x128xf32>
    %336 = arith.mulf %335, %335 : vector<8x128xf32>
    %cst_123 = arith.constant 1.500000e-02 : f32
    %337 = vector.broadcast %cst_123 : f32 to vector<8x128xf32>
    %338 = arith.mulf %337, %336 : vector<8x128xf32>
    %cst_124 = arith.constant 2.000000e+01 : f32
    %339 = vector.broadcast %cst_124 : f32 to vector<8x128xf32>
    %340 = arith.addf %339, %336 : vector<8x128xf32>
    %341 = math.rsqrt %340 : vector<8x128xf32>
    %342 = arith.mulf %338, %341 : vector<8x128xf32>
    %cst_125 = arith.constant 1.000000e+00 : f32
    %343 = vector.broadcast %cst_125 : f32 to vector<8x128xf32>
    %344 = arith.addf %343, %342 : vector<8x128xf32>
    %345 = arith.subf %264, %142 : vector<8x128xf32>
    %cst_126 = arith.constant 1.000000e+00 : f32
    %346 = vector.broadcast %cst_126 : f32 to vector<8x128xf32>
    %347 = arith.mulf %346, %344 : vector<8x128xf32>
    %348 = tpu.reciprocal %347 {approx = true} : vector<8x128xf32> -> vector<8x128xf32>
    %349 = arith.mulf %347, %348 : vector<8x128xf32>
    %cst_127 = arith.constant 2.000000e+00 : f32
    %350 = vector.broadcast %cst_127 : f32 to vector<8x128xf32>
    %351 = arith.subf %350, %349 : vector<8x128xf32>
    %352 = arith.mulf %348, %351 : vector<8x128xf32>
    %353 = arith.mulf %345, %352 : vector<8x128xf32>
    %354 = arith.addf %311, %323 : vector<8x128xf32>
    %cst_128 = arith.constant 5.000000e-01 : f32
    %355 = vector.broadcast %cst_128 : f32 to vector<8x128xf32>
    %356 = arith.mulf %355, %354 : vector<8x128xf32>
    %cst_129 = arith.constant 4.500000e-02 : f32
    %357 = vector.broadcast %cst_129 : f32 to vector<8x128xf32>
    %358 = arith.mulf %357, %356 : vector<8x128xf32>
    %cst_130 = arith.constant 1.000000e+00 : f32
    %359 = vector.broadcast %cst_130 : f32 to vector<8x128xf32>
    %360 = arith.addf %359, %358 : vector<8x128xf32>
    %361 = arith.subf %323, %311 : vector<8x128xf32>
    %cst_131 = arith.constant 1.000000e+00 : f32
    %362 = vector.broadcast %cst_131 : f32 to vector<8x128xf32>
    %363 = arith.mulf %362, %360 : vector<8x128xf32>
    %364 = tpu.reciprocal %363 {approx = true} : vector<8x128xf32> -> vector<8x128xf32>
    %365 = arith.mulf %363, %364 : vector<8x128xf32>
    %cst_132 = arith.constant 2.000000e+00 : f32
    %366 = vector.broadcast %cst_132 : f32 to vector<8x128xf32>
    %367 = arith.subf %366, %365 : vector<8x128xf32>
    %368 = arith.mulf %364, %367 : vector<8x128xf32>
    %369 = arith.mulf %361, %368 : vector<8x128xf32>
    %370 = arith.subf %330, %318 : vector<8x128xf32>
    %371 = arith.addf %318, %330 : vector<8x128xf32>
    %372 = arith.mulf %311, %323 : vector<8x128xf32>
    %cst_133 = arith.constant 3.14159274 : f32
    %373 = vector.broadcast %cst_133 : f32 to vector<8x128xf32>
    %374 = arith.cmpf ogt, %370, %373 : vector<8x128xf32>
    %cst_134 = arith.constant 6.28318548 : f32
    %375 = vector.broadcast %cst_134 : f32 to vector<8x128xf32>
    %376 = arith.subf %370, %375 : vector<8x128xf32>
    %377 = arith.select %374, %376, %370 : vector<8x128xi1>, vector<8x128xf32>
    %cst_135 = arith.constant -3.14159274 : f32
    %378 = vector.broadcast %cst_135 : f32 to vector<8x128xf32>
    %379 = arith.cmpf olt, %370, %378 : vector<8x128xf32>
    %cst_136 = arith.constant 6.28318548 : f32
    %380 = vector.broadcast %cst_136 : f32 to vector<8x128xf32>
    %381 = arith.addf %377, %380 : vector<8x128xf32>
    %382 = arith.select %379, %381, %377 : vector<8x128xi1>, vector<8x128xf32>
    %cst_137 = arith.constant 0.000000e+00 : f32
    %383 = vector.broadcast %cst_137 : f32 to vector<8x128xf32>
    %384 = arith.cmpf oeq, %372, %383 : vector<8x128xf32>
    %cst_138 = arith.constant 0.000000e+00 : f32
    %385 = vector.broadcast %cst_138 : f32 to vector<8x128xf32>
    %386 = arith.select %384, %385, %382 : vector<8x128xi1>, vector<8x128xf32>
    %cst_139 = arith.constant 9.99999997E-7 : f32
    %387 = vector.broadcast %cst_139 : f32 to vector<8x128xf32>
    %388 = arith.addf %372, %387 : vector<8x128xf32>
    %389 = math.sqrt %388 : vector<8x128xf32>
    %cst_140 = arith.constant 2.000000e+00 : f32
    %390 = vector.broadcast %cst_140 : f32 to vector<8x128xf32>
    %391 = arith.mulf %390, %389 : vector<8x128xf32>
    %cst_141 = arith.constant 5.000000e-01 : f32
    %392 = vector.broadcast %cst_141 : f32 to vector<8x128xf32>
    %393 = arith.mulf %392, %386 : vector<8x128xf32>
    %394 = math.sin %393 : vector<8x128xf32>
    %395 = arith.mulf %391, %394 : vector<8x128xf32>
    %cst_142 = arith.constant 0.000000e+00 : f32
    %396 = vector.broadcast %cst_142 : f32 to vector<8x128xf32>
    %397 = arith.cmpf one, %372, %396 : vector<8x128xf32>
    %398 = math.absf %370 : vector<8x128xf32>
    %cst_143 = arith.constant 3.14159274 : f32
    %399 = vector.broadcast %cst_143 : f32 to vector<8x128xf32>
    %400 = arith.cmpf ogt, %398, %399 : vector<8x128xf32>
    %401 = arith.andi %397, %400 : vector<8x128xi1>
    %cst_144 = arith.constant 6.28318548 : f32
    %402 = vector.broadcast %cst_144 : f32 to vector<8x128xf32>
    %403 = arith.cmpf olt, %371, %402 : vector<8x128xf32>
    %404 = arith.andi %401, %403 : vector<8x128xi1>
    %cst_145 = arith.constant 6.28318548 : f32
    %405 = vector.broadcast %cst_145 : f32 to vector<8x128xf32>
    %406 = arith.addf %371, %405 : vector<8x128xf32>
    %407 = arith.select %404, %406, %371 : vector<8x128xi1>, vector<8x128xf32>
    %cst_146 = arith.constant 6.28318548 : f32
    %408 = vector.broadcast %cst_146 : f32 to vector<8x128xf32>
    %409 = arith.cmpf oge, %371, %408 : vector<8x128xf32>
    %410 = arith.andi %401, %409 : vector<8x128xi1>
    %cst_147 = arith.constant 6.28318548 : f32
    %411 = vector.broadcast %cst_147 : f32 to vector<8x128xf32>
    %412 = arith.subf %407, %411 : vector<8x128xf32>
    %413 = arith.select %410, %412, %407 : vector<8x128xi1>, vector<8x128xf32>
    %cst_148 = arith.constant 0.000000e+00 : f32
    %414 = vector.broadcast %cst_148 : f32 to vector<8x128xf32>
    %415 = arith.cmpf oeq, %372, %414 : vector<8x128xf32>
    %cst_149 = arith.constant 2.000000e+00 : f32
    %416 = vector.broadcast %cst_149 : f32 to vector<8x128xf32>
    %417 = arith.mulf %413, %416 : vector<8x128xf32>
    %418 = arith.select %415, %417, %413 : vector<8x128xi1>, vector<8x128xf32>
    %cst_150 = arith.constant 5.000000e-01 : f32
    %419 = vector.broadcast %cst_150 : f32 to vector<8x128xf32>
    %420 = arith.mulf %418, %419 : vector<8x128xf32>
    %421 = math.cos %420 : vector<8x128xf32>
    %422 = math.sin %420 : vector<8x128xf32>
    %423 = arith.mulf %421, %421 : vector<8x128xf32>
    %424 = arith.mulf %422, %422 : vector<8x128xf32>
    %cst_151 = arith.constant 2.000000e+00 : f32
    %425 = vector.broadcast %cst_151 : f32 to vector<8x128xf32>
    %426 = arith.mulf %425, %423 : vector<8x128xf32>
    %cst_152 = arith.constant 1.000000e+00 : f32
    %427 = vector.broadcast %cst_152 : f32 to vector<8x128xf32>
    %428 = arith.subf %426, %427 : vector<8x128xf32>
    %cst_153 = arith.constant 2.000000e+00 : f32
    %429 = vector.broadcast %cst_153 : f32 to vector<8x128xf32>
    %430 = arith.mulf %429, %422 : vector<8x128xf32>
    %431 = arith.mulf %430, %421 : vector<8x128xf32>
    %cst_154 = arith.constant 4.000000e+00 : f32
    %432 = vector.broadcast %cst_154 : f32 to vector<8x128xf32>
    %433 = arith.mulf %432, %423 : vector<8x128xf32>
    %cst_155 = arith.constant 3.000000e+00 : f32
    %434 = vector.broadcast %cst_155 : f32 to vector<8x128xf32>
    %435 = arith.subf %433, %434 : vector<8x128xf32>
    %436 = arith.mulf %421, %435 : vector<8x128xf32>
    %cst_156 = arith.constant 4.000000e+00 : f32
    %437 = vector.broadcast %cst_156 : f32 to vector<8x128xf32>
    %438 = arith.mulf %437, %424 : vector<8x128xf32>
    %cst_157 = arith.constant 3.000000e+00 : f32
    %439 = vector.broadcast %cst_157 : f32 to vector<8x128xf32>
    %440 = arith.subf %439, %438 : vector<8x128xf32>
    %441 = arith.mulf %422, %440 : vector<8x128xf32>
    %cst_158 = arith.constant 2.000000e+00 : f32
    %442 = vector.broadcast %cst_158 : f32 to vector<8x128xf32>
    %443 = arith.mulf %442, %428 : vector<8x128xf32>
    %444 = arith.mulf %443, %428 : vector<8x128xf32>
    %cst_159 = arith.constant 1.000000e+00 : f32
    %445 = vector.broadcast %cst_159 : f32 to vector<8x128xf32>
    %446 = arith.subf %444, %445 : vector<8x128xf32>
    %cst_160 = arith.constant 2.000000e+00 : f32
    %447 = vector.broadcast %cst_160 : f32 to vector<8x128xf32>
    %448 = arith.mulf %447, %431 : vector<8x128xf32>
    %449 = arith.mulf %448, %428 : vector<8x128xf32>
    %cst_161 = arith.constant 0.866025388 : f32
    %450 = vector.broadcast %cst_161 : f32 to vector<8x128xf32>
    %451 = arith.mulf %421, %450 : vector<8x128xf32>
    %cst_162 = arith.constant 5.000000e-01 : f32
    %452 = vector.broadcast %cst_162 : f32 to vector<8x128xf32>
    %453 = arith.mulf %422, %452 : vector<8x128xf32>
    %454 = arith.addf %451, %453 : vector<8x128xf32>
    %cst_163 = arith.constant 1.700000e-01 : f32
    %455 = vector.broadcast %cst_163 : f32 to vector<8x128xf32>
    %456 = arith.mulf %455, %454 : vector<8x128xf32>
    %cst_164 = arith.constant 1.000000e+00 : f32
    %457 = vector.broadcast %cst_164 : f32 to vector<8x128xf32>
    %458 = arith.subf %457, %456 : vector<8x128xf32>
    %cst_165 = arith.constant 2.400000e-01 : f32
    %459 = vector.broadcast %cst_165 : f32 to vector<8x128xf32>
    %460 = arith.mulf %459, %428 : vector<8x128xf32>
    %461 = arith.addf %458, %460 : vector<8x128xf32>
    %cst_166 = arith.constant 0.994521915 : f32
    %462 = vector.broadcast %cst_166 : f32 to vector<8x128xf32>
    %463 = arith.mulf %436, %462 : vector<8x128xf32>
    %cst_167 = arith.constant 0.104528464 : f32
    %464 = vector.broadcast %cst_167 : f32 to vector<8x128xf32>
    %465 = arith.mulf %441, %464 : vector<8x128xf32>
    %466 = arith.subf %463, %465 : vector<8x128xf32>
    %cst_168 = arith.constant 3.200000e-01 : f32
    %467 = vector.broadcast %cst_168 : f32 to vector<8x128xf32>
    %468 = arith.mulf %467, %466 : vector<8x128xf32>
    %469 = arith.addf %461, %468 : vector<8x128xf32>
    %cst_169 = arith.constant 0.453990489 : f32
    %470 = vector.broadcast %cst_169 : f32 to vector<8x128xf32>
    %471 = arith.mulf %446, %470 : vector<8x128xf32>
    %cst_170 = arith.constant 0.891006529 : f32
    %472 = vector.broadcast %cst_170 : f32 to vector<8x128xf32>
    %473 = arith.mulf %449, %472 : vector<8x128xf32>
    %474 = arith.addf %471, %473 : vector<8x128xf32>
    %cst_171 = arith.constant 2.000000e-01 : f32
    %475 = vector.broadcast %cst_171 : f32 to vector<8x128xf32>
    %476 = arith.mulf %475, %474 : vector<8x128xf32>
    %477 = arith.subf %469, %476 : vector<8x128xf32>
    %cst_172 = arith.constant 1.500000e-02 : f32
    %478 = vector.broadcast %cst_172 : f32 to vector<8x128xf32>
    %479 = arith.mulf %478, %356 : vector<8x128xf32>
    %480 = arith.mulf %479, %477 : vector<8x128xf32>
    %cst_173 = arith.constant 1.000000e+00 : f32
    %481 = vector.broadcast %cst_173 : f32 to vector<8x128xf32>
    %482 = arith.addf %481, %480 : vector<8x128xf32>
    %cst_174 = arith.constant 1.000000e+00 : f32
    %483 = vector.broadcast %cst_174 : f32 to vector<8x128xf32>
    %484 = arith.mulf %483, %482 : vector<8x128xf32>
    %485 = tpu.reciprocal %484 {approx = true} : vector<8x128xf32> -> vector<8x128xf32>
    %486 = arith.mulf %484, %485 : vector<8x128xf32>
    %cst_175 = arith.constant 2.000000e+00 : f32
    %487 = vector.broadcast %cst_175 : f32 to vector<8x128xf32>
    %488 = arith.subf %487, %486 : vector<8x128xf32>
    %489 = arith.mulf %485, %488 : vector<8x128xf32>
    %490 = arith.mulf %395, %489 : vector<8x128xf32>
    %491 = arith.mulf %356, %356 : vector<8x128xf32>
    %492 = arith.mulf %356, %491 : vector<8x128xf32>
    %493 = arith.mulf %491, %491 : vector<8x128xf32>
    %494 = arith.mulf %492, %493 : vector<8x128xf32>
    %cst_176 = arith.constant 6.10351565E+9 : f32
    %495 = vector.broadcast %cst_176 : f32 to vector<8x128xf32>
    %496 = arith.addf %494, %495 : vector<8x128xf32>
    %497 = tpu.reciprocal %496 {approx = true} : vector<8x128xf32> -> vector<8x128xf32>
    %498 = arith.mulf %496, %497 : vector<8x128xf32>
    %cst_177 = arith.constant 2.000000e+00 : f32
    %499 = vector.broadcast %cst_177 : f32 to vector<8x128xf32>
    %500 = arith.subf %499, %498 : vector<8x128xf32>
    %501 = arith.mulf %497, %500 : vector<8x128xf32>
    %502 = arith.mulf %494, %501 : vector<8x128xf32>
    %cst_178 = arith.constant 9.99999997E-7 : f32
    %503 = vector.broadcast %cst_178 : f32 to vector<8x128xf32>
    %504 = arith.addf %502, %503 : vector<8x128xf32>
    %505 = math.sqrt %504 : vector<8x128xf32>
    %cst_179 = arith.constant 2.000000e+00 : f32
    %506 = vector.broadcast %cst_179 : f32 to vector<8x128xf32>
    %507 = arith.mulf %506, %505 : vector<8x128xf32>
    %cst_180 = arith.constant 57.2957802 : f32
    %508 = vector.broadcast %cst_180 : f32 to vector<8x128xf32>
    %509 = arith.mulf %420, %508 : vector<8x128xf32>
    %cst_181 = arith.constant 2.750000e+02 : f32
    %510 = vector.broadcast %cst_181 : f32 to vector<8x128xf32>
    %511 = arith.subf %509, %510 : vector<8x128xf32>
    %cst_182 = arith.constant 4.000000e-02 : f32
    %512 = vector.broadcast %cst_182 : f32 to vector<8x128xf32>
    %513 = arith.mulf %511, %512 : vector<8x128xf32>
    %514 = arith.mulf %513, %513 : vector<8x128xf32>
    %cst_183 = arith.constant 0.000000e+00 : f32
    %515 = vector.broadcast %cst_183 : f32 to vector<8x128xf32>
    %516 = arith.subf %515, %514 : vector<8x128xf32>
    %517 = math.exp %516 : vector<8x128xf32>
    %cst_184 = arith.constant 0.52359879 : f32
    %518 = vector.broadcast %cst_184 : f32 to vector<8x128xf32>
    %519 = arith.mulf %518, %517 : vector<8x128xf32>
    %cst_185 = arith.constant 2.000000e+00 : f32
    %520 = vector.broadcast %cst_185 : f32 to vector<8x128xf32>
    %521 = arith.mulf %520, %519 : vector<8x128xf32>
    %522 = math.sin %521 : vector<8x128xf32>
    %cst_186 = arith.constant 0.000000e+00 : f32
    %523 = vector.broadcast %cst_186 : f32 to vector<8x128xf32>
    %524 = arith.subf %523, %522 : vector<8x128xf32>
    %525 = arith.mulf %524, %507 : vector<8x128xf32>
    %526 = arith.mulf %525, %369 : vector<8x128xf32>
    %527 = arith.mulf %526, %490 : vector<8x128xf32>
    %528 = arith.mulf %353, %353 : vector<8x128xf32>
    %529 = arith.mulf %369, %369 : vector<8x128xf32>
    %530 = arith.addf %528, %529 : vector<8x128xf32>
    %531 = arith.mulf %490, %490 : vector<8x128xf32>
    %532 = arith.addf %530, %531 : vector<8x128xf32>
    %533 = arith.addf %532, %527 : vector<8x128xf32>
    %cst_187 = arith.constant 0.000000e+00 : f32
    %534 = vector.broadcast %cst_187 : f32 to vector<8x128xf32>
    %535 = arith.maximumf %533, %534 : vector<8x128xf32>
    %536 = math.sqrt %535 : vector<8x128xf32>
    %537 = arith.addi %0, %8 : i32
    %c128_i32_188 = arith.constant 128 : i32
    %538 = arith.muli %537, %c128_i32_188 : i32
    %c256_i32 = arith.constant 256 : i32
    %539 = arith.subi %c256_i32, %538 : i32
    %540 = vector.broadcast %539 : i32 to vector<8x128xi32>
    %541 = arith.cmpi slt, %5, %540 : vector<8x128xi32>
    %cst_189 = arith.constant 0.000000e+00 : f32
    %542 = vector.broadcast %cst_189 : f32 to vector<8x128xf32>
    %543 = arith.select %541, %536, %542 : vector<8x128xi1>, vector<8x128xf32>
    %544 = arith.addf %6, %543 : vector<8x128xf32>
    %c1_i32 = arith.constant 1 : i32
    %c0_190 = arith.constant 0 : index
    %c0_191 = arith.constant 0 : index
    %c0_192 = arith.constant 0 : index
    %545 = vector.load %arg3[%c0_190, %c0_191, %c0_192] : memref<1x8x128xf32, #tpu.memory_space<vmem>>, vector<1x8x128xf32>
    %546 = vector.shape_cast %545 : vector<1x8x128xf32> to vector<8x128xf32>
    %547 = vector.shape_cast %544 : vector<8x128xf32> to vector<1x8x128xf32>
    tpu.vector_store %arg3[%c0_190, %c0_191, %c0_192], %547 {strides = array<i32>} : memref<1x8x128xf32, #tpu.memory_space<vmem>>, vector<1x8x128xf32>,
    return
  }
  func.func @transform_0(%arg0: i32) -> (i32, i32, i32) {
    %c0_i32 = arith.constant 0 : i32
    %c0_i32_0 = arith.constant 0 : i32
    %c0_i32_1 = arith.constant 0 : i32
    return %c0_i32, %arg0, %c0_i32_0 : i32, i32, i32
  }
  func.func @transform_1(%arg0: i32) -> (i32, i32, i32) {
    %c0_i32 = arith.constant 0 : i32
    %c0_i32_0 = arith.constant 0 : i32
    %c0_i32_1 = arith.constant 0 : i32
    return %c0_i32, %arg0, %c0_i32_0 : i32, i32, i32
  }
  func.func @transform_2(%arg0: i32) -> (i32, i32, i32) {
    %c0_i32 = arith.constant 0 : i32
    %c0_i32_0 = arith.constant 0 : i32
    %c0_i32_1 = arith.constant 0 : i32
    return %arg0, %c0_i32, %c0_i32_0 : i32, i32, i32
  }
}

</mosaic_0001>

<bundles_post_ra>
// kernel: _color_loss.2
= control target key start
LH: loop header
LB: loop body
LE: loop exit
PB: predicated region body
PF: predicated region fallthrough
CT: control target
= control target key end

     0   :  { %s1566_s0 = inlined_call_operand.vmem [shape: f32[1,3,8,128], index: 0, kind: input, shape index: {}]   ;;  %s1567_s1 = inlined_call_operand.vmem [shape: f32[1,3,8,128], index: 1, kind: input, shape index: {}]   ;;  %s1568_s2 = inlined_call_operand.vmem [shape: f32[1,8,128], index: 2, kind: output, shape index: {}]  }
   0x1   :  { %v1143_v0 = vld [vmem:[%s1567_s1] sm:$0xff]  ;;  %v1148_v1 = vld [vmem:[%s1567_s1 + $0x8] sm:$0xff]  ;;  %v1153_v2 = vld [vmem:[%s1567_s1 + $0x10] sm:$0xff] }
   0x2   :  { %v56_v3 = vadd.f32 0.055, %v1143_v0  ;;  %v1159_v4 = vld [vmem:[%s1566_s0] sm:$0xff]  ;;  %v66_v6 = vadd.f32 0.055, %v1148_v1  ;;  %v1165_v7 = vld [vmem:[%s1566_s0 + $0x8] sm:$0xff] }
   0x3   :  { %v76_v8 = vadd.f32 0.055, %v1153_v2  ;;  %v1171_v9 = vld [vmem:[%s1566_s0 + $0x10] sm:$0xff]  ;;  %v142_v12 = vadd.f32 0.055, %v1159_v4 }
   0x4   :  { %v57_v5 = vmul.f32 0.9478673, %v56_v3  ;;  %v67_v10 = vmul.f32 0.9478673, %v66_v6  ;;  %v152_v13 = vadd.f32 0.055, %v1165_v7 }
   0x5   :  { %v77_v11 = vmul.f32 0.9478673, %v76_v8  ;;  %v143_v14 = vmul.f32 0.9478673, %v142_v12  ;;  %v162_v15 = vadd.f32 0.055, %v1171_v9 }
   0x6   :  { %1023 = vlog2.f32 %v57_v5  ;;  %v153_v16 = vmul.f32 0.9478673, %v152_v13  ;;  %v64_v42 = vmul.f32 0.07739938, %v1143_v0  ;;  %vm63_vm0 = vcmp.gt.f32.partialorder %v1143_v0, 0.04045 }
   0x7   :  { %1025 = vlog2.f32 %v67_v10  ;;  %v163_v17 = vmul.f32 0.9478673, %v162_v15  ;;  %v74_v43 = vmul.f32 0.07739938, %v1148_v1  ;;  %vm73_vm1 = vcmp.gt.f32.partialorder %v1148_v1, 0.04045 }
   0x8   :  { %1027 = vlog2.f32 %v77_v11  ;;  %vm83_vm2 = vcmp.gt.f32.partialorder %v1153_v2, 0.04045  ;;  %v84_v45 = vmul.f32 0.07739938, %v1153_v2  ;;  %vm149_vm3 = vcmp.gt.f32.partialorder %v1159_v4, 0.04045 }
   0x9   :  { %1029 = vlog2.f32 %v143_v14  ;;  %v150_v47 = vmul.f32 0.07739938, %v1159_v4  ;;  %vm159_vm4 = vcmp.gt.f32.partialorder %v1165_v7, 0.04045  ;;  %v160_v54 = vmul.f32 0.07739938, %v1165_v7 }
   0xa   :  { %1031 = vlog2.f32 %v153_v16  ;;  %vm169_vm5 = vcmp.gt.f32.partialorder %v1171_v9, 0.04045  ;;  %v170_v55 = vmul.f32 0.07739938, %v1171_v9 }
   0xb   :  { %1033 = vlog2.f32 %v163_v17 }
  0x10   :  { %v1024_v18 = vpop.eup %1023 }
  0x11   :  { %v59_v19 = vmul.f32 0.6931472, %v1024_v18  ;;  %v1026_v20 = vpop.eup %1025 }
  0x12   :  { %v1028_v21 = vpop.eup %1027  ;;  %v69_v23 = vmul.f32 0.6931472, %v1026_v20 }
  0x13   :  { %v60_v22 = vmul.f32 2.4, %v59_v19  ;;  %v79_v24 = vmul.f32 0.6931472, %v1028_v21  ;;  %v1030_v25 = vpop.eup %1029 }
  0x14   :  { %v70_v27 = vmul.f32 2.4, %v69_v23  ;;  %v1032_v28 = vpop.eup %1031  ;;  %v145_v30 = vmul.f32 0.6931472, %v1030_v25 }
  0x15   :  { %v61_v26 = vmul.f32 1.442695, %v60_v22  ;;  %v80_v29 = vmul.f32 2.4, %v79_v24  ;;  %v1034_v31 = vpop.eup %1033  ;;  %v155_v33 = vmul.f32 0.6931472, %v1032_v28 }
  0x16   :  { %v71_v32 = vmul.f32 1.442695, %v70_v27  ;;  %v146_v35 = vmul.f32 2.4, %v145_v30  ;;  %v165_v36 = vmul.f32 0.6931472, %v1034_v31 }
  0x17   :  { %1035 = vpow2.f32 %v61_v26  ;;  %v81_v34 = vmul.f32 1.442695, %v80_v29  ;;  %v156_v37 = vmul.f32 2.4, %v155_v33 }
  0x18   :  { %1037 = vpow2.f32 %v71_v32  ;;  %v147_v38 = vmul.f32 1.442695, %v146_v35  ;;  %v166_v39 = vmul.f32 2.4, %v165_v36 }
  0x19   :  { %1039 = vpow2.f32 %v81_v34  ;;  %v157_v40 = vmul.f32 1.442695, %v156_v37 }
  0x1a   :  { %1041 = vpow2.f32 %v147_v38  ;;  %v167_v41 = vmul.f32 1.442695, %v166_v39 }
  0x1b   :  { %1043 = vpow2.f32 %v157_v40 }
  0x1c   :  { %1045 = vpow2.f32 %v167_v41 }
  0x21   :  { %v1036_v44 = vpop.eup %1035 }
  0x22   :  { %v65_v46 = vsel %vm63_vm0, %v1036_v44, %v64_v42  ;;  %v1038_v48 = vpop.eup %1037 }
  0x23   :  { %v86_v49 = vmul.f32 0.412453, %v65_v46  ;;  %v91_v50 = vmul.f32 0.212671, %v65_v46  ;;  %v96_v51 = vmul.f32 0.019334, %v65_v46  ;;  %v1040_v52 = vpop.eup %1039  ;;  %v75_v53 = vsel %vm73_vm1, %v1038_v48, %v74_v43 }
  0x24   :  { %v85_v56 = vsel %vm83_vm2, %v1040_v52, %v84_v45  ;;  %v87_v57 = vmul.f32 0.35758, %v75_v53  ;;  %v92_v58 = vmul.f32 0.71516, %v75_v53  ;;  %v97_v59 = vmul.f32 0.119193, %v75_v53  ;;  %v1042_v60 = vpop.eup %1041 }
  0x25   :  { %v89_v61 = vmul.f32 0.180423, %v85_v56  ;;  %v94_v62 = vmul.f32 0.072169, %v85_v56  ;;  %v99_v63 = vmul.f32 0.950227, %v85_v56  ;;  %v1044_v0 = vpop.eup %1043  ;;  %v151_v5 = vsel %vm149_vm3, %v1042_v60, %v150_v47 }
  0x26   :  { %v88_v1 = vadd.f32 %v87_v57, %v86_v49  ;;  %v93_v2 = vadd.f32 %v92_v58, %v91_v50  ;;  %v98_v3 = vadd.f32 %v97_v59, %v96_v51  ;;  %v1046_v6 = vpop.eup %1045  ;;  %v161_v8 = vsel %vm159_vm4, %v1044_v0, %v160_v54 }
  0x27   :  { %v172_v10 = vmul.f32 0.412453, %v151_v5  ;;  %v171_v14 = vsel %vm169_vm5, %v1046_v6, %v170_v55  ;;  %v173_v15 = vmul.f32 0.35758, %v161_v8  ;;  %v177_v16 = vmul.f32 0.212671, %v151_v5 }
  0x28   :  { %v90_v11 = vadd.f32 %v89_v61, %v88_v1  ;;  %v1192_v12 = vadd.f32 %v94_v62, %v93_v2  ;;  %v100_v13 = vadd.f32 %v99_v63, %v98_v3  ;;  %v178_v17 = vmul.f32 0.71516, %v161_v8 }
  0x29   :  { %v175_v4 = vmul.f32 0.180423, %v171_v14  ;;  %v174_v7 = vadd.f32 %v173_v15, %v172_v10  ;;  %v182_v24 = vmul.f32 0.019334, %v151_v5  ;;  %v180_v25 = vmul.f32 0.072169, %v171_v14 }
  0x2a   :  { %v1196_v18 = vmul.f32 1.052111, %v90_v11  ;;  %v1198_v19 = vmul.f32 0.91841704, %v100_v13  ;;  %v115_v20 = vmax.f32 %v1192_v12, 1e-12  ;;  %v179_v23 = vadd.f32 %v178_v17, %v177_v16 }
  0x2b   :  { %v176_v9 = vadd.f32 %v175_v4, %v174_v7  ;;  %v183_v26 = vmul.f32 0.119193, %v161_v8  ;;  %v185_v27 = vmul.f32 0.950227, %v171_v14  ;;  %v121_v47 = vmul.f32 903.3, %v1192_v12 }
  0x2c   :  { %v104_v21 = vmax.f32 %v1196_v18, 1e-12  ;;  %1047 = vlog2.f32 %v115_v20  ;;  %v126_v22 = vmax.f32 %v1198_v19, 1e-12  ;;  %v1203_v28 = vadd.f32 %v180_v25, %v179_v23 }
  0x2d   :  { %v184_v29 = vadd.f32 %v183_v26, %v182_v24  ;;  %v1205_v30 = vmul.f32 1.052111, %v176_v9  ;;  %v110_v48 = vmul.f32 903.3, %v1196_v18  ;;  %v132_v51 = vmul.f32 903.3, %v1198_v19 }
  0x2e   :  { %1049 = vlog2.f32 %v104_v21  ;;  %v201_v33 = vmax.f32 %v1203_v28, 1e-12  ;;  %v122_v54 = vadd.f32 16.0, %v121_v47  ;;  %vm114_vm6 = vcmp.gt.f32.partialorder %v1192_v12, 0.008856 }
  0x2f   :  { %1051 = vlog2.f32 %v126_v22  ;;  %v186_v31 = vadd.f32 %v185_v27, %v184_v29  ;;  %v190_v32 = vmax.f32 %v1205_v30, 1e-12  ;;  %v111_v56 = vadd.f32 16.0, %v110_v48 }
  0x30   :  { %v133_v59 = vadd.f32 16.0, %v132_v51  ;;  %v123_v63 = vmul.f32 0.00862069, %v122_v54  ;;  %v196_v0 = vmul.f32 903.3, %v1205_v30 }
  0x31   :  { %v1209_v34 = vmul.f32 0.91841704, %v186_v31  ;;  %1053 = vlog2.f32 %v190_v32  ;;  %v112_v2 = vmul.f32 0.00862069, %v111_v56  ;;  %v207_v3 = vmul.f32 903.3, %v1203_v28 }
  0x32   :  { %1055 = vlog2.f32 %v201_v33  ;;  %vm103_vm7 = vcmp.gt.f32.partialorder %v1196_v18, 0.008856  ;;  %v134_v6 = vmul.f32 0.00862069, %v133_v59  ;;  %vm125_vm8 = vcmp.gt.f32.partialorder %v1198_v19, 0.008856 }
  0x33   :  { %v212_v36 = vmax.f32 %v1209_v34, 1e-12  ;;  %v197_v14 = vadd.f32 16.0, %v196_v0  ;;  %v218_v15 = vmul.f32 903.3, %v1209_v34  ;;  %v208_v4 = vadd.f32 16.0, %v207_v3 }
  0x34   :  { %vm189_vm9 = vcmp.gt.f32.partialorder %v1205_v30, 0.008856  ;;  %vm200_vm10 = vcmp.gt.f32.partialorder %v1203_v28, 0.008856  ;;  %vm211_vm11 = vcmp.gt.f32.partialorder %v1209_v34, 0.008856 }
  0x35   :  { %1057 = vlog2.f32 %v212_v36  ;;  %v198_v22 = vmul.f32 0.00862069, %v197_v14  ;;  %v219_v23 = vadd.f32 16.0, %v218_v15  ;;  %v209_v12 = vmul.f32 0.00862069, %v208_v4 }
  0x36   :  { %v1048_v35 = vpop.eup %1047 }
  0x37   :  { %v117_v38 = vmul.f32 0.6931472, %v1048_v35  ;;  %v220_v29 = vmul.f32 0.00862069, %v219_v23 }
  0x38   :  { %v1050_v37 = vpop.eup %1049 }
  0x39   :  { %v1052_v39 = vpop.eup %1051  ;;  %v106_v40 = vmul.f32 0.6931472, %v1050_v37  ;;  %v118_v41 = vmul.f32 0.33333334, %v117_v38 }
  0x3a   :  { %v128_v42 = vmul.f32 0.6931472, %v1052_v39 }
  0x3b   :  { %v107_v43 = vmul.f32 0.33333334, %v106_v40  ;;  %v119_v44 = vmul.f32 1.442695, %v118_v41  ;;  %v1054_v50 = vpop.eup %1053 }
  0x3c   :  { %v129_v45 = vmul.f32 0.33333334, %v128_v42  ;;  %v1056_v52 = vpop.eup %1055  ;;  %v192_v53 = vmul.f32 0.6931472, %v1054_v50 }
  0x3d   :  { %v108_v46 = vmul.f32 1.442695, %v107_v43  ;;  %1059 = vpow2.f32 %v119_v44  ;;  %v203_v55 = vmul.f32 0.6931472, %v1056_v52 }
  0x3e   :  { %v130_v49 = vmul.f32 1.442695, %v129_v45  ;;  %v193_v57 = vmul.f32 0.33333334, %v192_v53 }
  0x3f   :  { %1061 = vpow2.f32 %v108_v46  ;;  %v1058_v58 = vpop.eup %1057  ;;  %v204_v60 = vmul.f32 0.33333334, %v203_v55 }
  0x40   :  { %1063 = vpow2.f32 %v130_v49  ;;  %v194_v61 = vmul.f32 1.442695, %v193_v57  ;;  %v214_v62 = vmul.f32 0.6931472, %v1058_v58 }
  0x41   :  { %v205_v1 = vmul.f32 1.442695, %v204_v60 }
  0x42   :  { %1065 = vpow2.f32 %v194_v61  ;;  %v215_v5 = vmul.f32 0.33333334, %v214_v62 }
  0x43   :  { %1067 = vpow2.f32 %v205_v1 }
  0x44   :  { %v216_v10 = vmul.f32 1.442695, %v215_v5 }
  0x46   :  { %1069 = vpow2.f32 %v216_v10 }
  0x47   :  { %v1060_v8 = vpop.eup %1059 }
  0x48   :  { %v124_v13 = vsel %vm114_vm6, %v1060_v8, %v123_v63 }
  0x49   :  { %v1062_v11 = vpop.eup %1061  ;;  %v136_v44 = vmul.f32 116.0, %v124_v13 }
  0x4a   :  { %v1064_v16 = vpop.eup %1063  ;;  %v113_v17 = vsel %vm103_vm7, %v1062_v11, %v112_v2 }
  0x4b   :  { %v135_v20 = vsel %vm125_vm8, %v1064_v16, %v134_v6  ;;  %v138_v7 = vsub.f32 %v113_v17, %v124_v13  ;;  %v978_v50 = vadd.f32 -16.0, %v136_v44 }
  0x4c   :  { %v140_v18 = vsub.f32 %v124_v13, %v135_v20  ;;  %v1066_v9 = vpop.eup %1065 }
  0x4d   :  { %v1223_v21 = vmul.f32 500.0, %v138_v7  ;;  %v1068_v26 = vpop.eup %1067  ;;  %v199_v27 = vsel %vm189_vm9, %v1066_v9, %v198_v22 }
  0x4e   :  { %v1225_v19 = vmul.f32 200.0, %v140_v18  ;;  %v210_v31 = vsel %vm200_vm10, %v1068_v26, %v209_v12 }
  0x4f   :  { %v228_v24 = vmul.f32 %v1223_v21, %v1223_v21  ;;  %v224_v30 = vsub.f32 %v199_v27, %v210_v31  ;;  %v222_v45 = vmul.f32 116.0, %v210_v31 }
  0x50   :  { %v1233_v25 = vmul.f32 %v1225_v19, %v1225_v19  ;;  %v1070_v33 = vpop.eup %1069  ;;  %vm318_vm8 = vcmp.ne.f32.partialorder %v1225_v19, %v1225_v19 }
  0x51   :  { %v221_v28 = vsel %vm211_vm11, %v1070_v33, %v220_v29  ;;  %v1237_v36 = vmul.f32 500.0, %v224_v30  ;;  %v979_v51 = vadd.f32 -16.0, %v222_v45  ;;  %v1254_v33 = vand.u32 2147483647, %v1225_v19 }
  0x52   :  { %v230_v32 = vadd.f32 %v1233_v25, %v228_v24  ;;  %v226_v37 = vsub.f32 %v210_v31, %v221_v28 }
  0x53   :  { %v239_v39 = vmul.f32 %v1237_v36, %v1237_v36  ;;  %v393_v57 = vadd.f32 %v979_v51, %v978_v50  ;;  %v402_v58 = vsub.f32 %v979_v51, %v978_v50  ;;  %vm324_vm11 = vcmp.eq.s32.totalorder %v1254_v33, inf }
  0x54   :  { %v231_v35 = vadd.f32 1e-06, %v230_v32  ;;  %v1239_v38 = vmul.f32 200.0, %v226_v37 }
  0x55   :  { %v394_v60 = vmul.f32 0.5, %v393_v57 }
  0x56   :  { %1071 = vrsqrt.f32 %v231_v35  ;;  %v1245_v40 = vmul.f32 %v1239_v38, %v1239_v38  ;;  %vm234_vm12 = vcmp.eq.f32.partialorder %v231_v35, inf  ;;  %v237_v46 = vand.u32 2147483648, %v231_v35 }
  0x57   :  { %vm236_vm13 = vcmp.eq.f32.partialorder %v231_v35, 0.0  ;;  %v980_v62 = vadd.f32 -50.0, %v394_v60 }
  0x58   :  { %v241_v34 = vadd.f32 %v1245_v40, %v239_v39 }
  0x59   :  { %v396_v1 = vmul.f32 %v980_v62, %v980_v62 }
  0x5a   :  { %v242_v41 = vadd.f32 1e-06, %v241_v34 }
  0x5b   :  { %v398_v3 = vadd.f32 20.0, %v396_v1  ;;  %v397_v6 = vmul.f32 0.015, %v396_v1 }
  0x5c   :  { %1073 = vrsqrt.f32 %v242_v41  ;;  %vm245_vm14 = vcmp.eq.f32.partialorder %v242_v41, inf  ;;  %v248_v49 = vand.u32 2147483648, %v242_v41  ;;  %vm247_vm15 = vcmp.eq.f32.partialorder %v242_v41, 0.0 }
  0x5d   :  { %1075 = vrsqrt.f32 %v398_v3 }
  0x60   :  { %v1072_v42 = vpop.eup %1071 }
  0x61   :  { %v233_v43 = vmul.f32 %v1072_v42, %v231_v35 }
  0x63   :  { %v235_v47 = vsel %vm234_vm12, %v231_v35, %v233_v43 }
  0x64   :  { %v238_v53 = vsel %vm236_vm13, %v237_v46, %v235_v47 }
  0x66   :  { %v1074_v48 = vpop.eup %1073 }
  0x67   :  { %v244_v52 = vmul.f32 %v1074_v48, %v242_v41  ;;  %v1076_v8 = vpop.eup %1075 }
  0x68   :  { %v400_v10 = vmul.f32 %v1076_v8, %v397_v6 }
  0x69   :  { %v246_v54 = vsel %vm245_vm14, %v242_v41, %v244_v52  ;;  %v1270_v41 = vand.u32 2147483647, %v1239_v38  ;;  %vm315_vm14 = vcmp.eq.f32.partialorder %v1225_v19, 0.0 }
  0x6a   :  { %v249_v55 = vsel %vm247_vm15, %v248_v49, %v246_v54  ;;  %v401_v14 = vadd.f32 1.0, %v400_v10 }
  0x6b   :  { %v250_v56 = vadd.f32 %v249_v55, %v238_v53 }
  0x6d   :  { %v251_v59 = vmul.f32 0.5, %v250_v56 }
  0x6f   :  { %v252_v61 = vmul.f32 %v251_v59, %v251_v59 }
  0x71   :  { %v253_v63 = vmul.f32 %v252_v61, %v251_v59  ;;  %v254_v0 = vmul.f32 %v252_v61, %v252_v61 }
  0x73   :  { %v255_v2 = vmul.f32 %v254_v0, %v253_v63 }
  0x75   :  { %v256_v5 = vadd.f32 6.1035156e+09, %v255_v2 }
  0x77   :  { %1077 = vrcp.f32 %v256_v5 }
  0x78   :  { %1079 = vrcp.f32 %v401_v14 }
  0x81   :  { %v1078_v11 = vpop.eup %1077 }
  0x82   :  { %v258_v13 = vmul.f32 %v1078_v11, %v256_v5  ;;  %v1080_v20 = vpop.eup %1079 }
  0x83   :  { %v404_v7 = vmul.f32 %v1080_v20, %v401_v14 }
  0x84   :  { %v259_v15 = vsub.f32 2.0, %v258_v13 }
  0x85   :  { %v405_v18 = vsub.f32 2.0, %v404_v7 }
  0x86   :  { %v260_v16 = vmul.f32 %v1078_v11, %v259_v15 }
  0x87   :  { %v406_v22 = vmul.f32 %v1080_v20, %v405_v18 }
  0x88   :  { %v261_v17 = vmul.f32 %v260_v16, %v255_v2 }
  0x89   :  { %v1248_v23 = vmul.f32 %v406_v22, %v402_v58 }
  0x8a   :  { %v262_v4 = vadd.f32 1e-06, %v261_v17 }
  0x8c   :  { %1081 = vrsqrt.f32 %v262_v4  ;;  %vm265_vm0 = vcmp.eq.f32.partialorder %v262_v4, inf  ;;  %v268_v24 = vand.u32 2147483648, %v262_v4  ;;  %vm267_vm1 = vcmp.eq.f32.partialorder %v262_v4, 0.0 }
  0x96   :  { %v1082_v12 = vpop.eup %1081 }
  0x97   :  { %v264_v9 = vmul.f32 %v1082_v12, %v262_v4 }
  0x99   :  { %v266_v26 = vsel %vm265_vm0, %v262_v4, %v264_v9 }
  0x9a   :  { %v269_v27 = vsel %vm267_vm1, %v268_v24, %v266_v26 }
  0x9b   :  { %v270_v29 = vsub.f32 1.0, %v269_v27 }
  0x9d   :  { %v271_v31 = vmul.f32 0.5, %v270_v29 }
  0x9f   :  { %v272_v32 = vadd.f32 1.0, %v271_v31 }
  0xa1   :  { %v1251_v30 = vmul.f32 %v272_v32, %v1223_v21  ;;  %v1257_v35 = vmul.f32 %v272_v32, %v1237_v36 }
  0xa3   :  { %v274_v28 = vmul.f32 %v1251_v30, %v1251_v30  ;;  %v1262_v37 = vand.u32 2147483647, %v1251_v30  ;;  %v334_v39 = vmul.f32 %v1257_v35, %v1257_v35  ;;  %v1274_v42 = vand.u32 2147483647, %v1257_v35 }
  0xa4   :  { %vm313_vm7 = vcmp.lt.s32.totalorder %v1251_v30, 0  ;;  %vm310_vm9 = vcmp.lt.f32.partialorder %v1251_v30, 0.0  ;;  %vm317_vm10 = vcmp.ne.f32.partialorder %v1251_v30, %v1251_v30  ;;  %vm373_vm15 = vcmp.lt.s32.totalorder %v1257_v35, 0 }
  0xa5   :  { %v275_v34 = vadd.f32 %v274_v28, %v1233_v25  ;;  %v286_v21 = vmax.f32 %v1262_v37, %v1254_v33  ;;  %v335_v36 = vadd.f32 %v334_v39, %v1245_v40  ;;  %v346_v43 = vmax.f32 %v1274_v42, %v1270_v41  ;;  %vm1309_vm0 = vmor %vm317_vm10, %vm318_vm8 }
  0xa6   :  { %v285_v25 = vmin.f32 %v1262_v37, %v1254_v33  ;;  %v345_v40 = vmin.f32 %v1274_v42, %v1270_v41  ;;  %vm307_vm6 = vcmp.gt.f32.partialorder %v1254_v33, %v1262_v37  ;;  %vm323_vm12 = vcmp.eq.s32.totalorder %v1262_v37, inf }
  0xa7   :  { %1083 = vrsqrt.f32 %v275_v34  ;;  %vm278_vm2 = vcmp.eq.f32.partialorder %v275_v34, inf  ;;  %v281_v48 = vand.u32 2147483648, %v275_v34  ;;  %vm338_vm3 = vcmp.eq.f32.partialorder %v335_v36, inf }
  0xa8   :  { %1085 = vrcp.f32 %v286_v21  ;;  %v341_v50 = vand.u32 2147483648, %v335_v36  ;;  %vm280_vm4 = vcmp.eq.f32.partialorder %v275_v34, 0.0  ;;  %vm340_vm5 = vcmp.eq.f32.partialorder %v335_v36, 0.0 }
  0xa9   :  { %1087 = vrsqrt.f32 %v335_v36  ;;  %vm367_vm13 = vcmp.gt.f32.partialorder %v1270_v41, %v1274_v42  ;;  %vm377_vm1 = vcmp.ne.f32.partialorder %v1257_v35, %v1257_v35 }
  0xaa   :  { %1089 = vrcp.f32 %v346_v43 }
  0xb1   :  { %v1084_v44 = vpop.eup %1083 }
  0xb2   :  { %v1086_v45 = vpop.eup %1085  ;;  %v277_v46 = vmul.f32 %v1084_v44, %v275_v34 }
  0xb3   :  { %v1088_v47 = vpop.eup %1087  ;;  %v288_v49 = vmul.f32 %v1086_v45, %v285_v25 }
  0xb4   :  { %v279_v51 = vsel %vm278_vm2, %v275_v34, %v277_v46  ;;  %v337_v52 = vmul.f32 %v1088_v47, %v335_v36  ;;  %v1090_v53 = vpop.eup %1089  ;;  %vm378_vm2 = vcmp.ne.f32.partialorder %v1239_v38, %v1239_v38 }
  0xb5   :  { %v289_v54 = vmul.f32 %v288_v49, %v288_v49  ;;  %v348_v56 = vmul.f32 %v1090_v53, %v345_v40  ;;  %v1282_v57 = vsel %vm280_vm4, %v281_v48, %v279_v51  ;;  %vm325_vm4 = vmand %vm323_vm12, %vm324_vm11 }
  0xb6   :  { %v339_v55 = vsel %vm338_vm3, %v335_v36, %v337_v52  ;;  %vm384_vm3 = vcmp.eq.s32.totalorder %v1270_v41, inf  ;;  %vm379_vm8 = vmor %vm377_vm1, %vm378_vm2 }
  0xb7   :  { %v290_v58 = vmul.f32 0.002785687, %v289_v54  ;;  %v1284_v59 = vsel %vm340_vm5, %v341_v50, %v339_v55  ;;  %v349_v60 = vmul.f32 %v348_v56, %v348_v56  ;;  %vm370_vm5 = vcmp.lt.f32.partialorder %v1257_v35, 0.0 }
  0xb8   :  { %v408_v61 = vadd.f32 %v1284_v59, %v1282_v57  ;;  %v412_v62 = vsub.f32 %v1284_v59, %v1282_v57  ;;  %v1119_v55 = vmov 683565275  }
  0xb9   :  { %v291_v63 = vadd.f32 -0.015866, %v290_v58  ;;  %v350_v0 = vmul.f32 0.002785687, %v349_v60  ;;  %v1118_v58 = vmov 0.7853982  }
  0xba   :  { %v1290_v1 = vmul.f32 0.5, %v408_v61  ;;  %v382_v33 = vsel %vm370_vm5, 2.3561945, %v1118_v58 }
  0xbb   :  { %v292_v2 = vmul.f32 %v291_v63, %v289_v54  ;;  %v351_v3 = vadd.f32 -0.015866, %v350_v0 }
  0xbc   :  { %v410_v5 = vmul.f32 0.045, %v1290_v1 }
  0xbd   :  { %v293_v6 = vadd.f32 0.04247222, %v292_v2  ;;  %v352_v8 = vmul.f32 %v351_v3, %v349_v60  ;;  %v328_v2 = vand.u32 2147483648, %v1225_v19 }
  0xbe   :  { %v411_v10 = vadd.f32 1.0, %v410_v5 }
  0xbf   :  { %v294_v11 = vmul.f32 %v293_v6, %v289_v54  ;;  %v353_v13 = vadd.f32 0.04247222, %v352_v8  ;;  %v388_v6 = vand.u32 2147483648, %v1239_v38 }
  0xc0   :  { %1091 = vrcp.f32 %v411_v10 }
  0xc1   :  { %v295_v14 = vadd.f32 -0.074975304, %v294_v11  ;;  %v354_v15 = vmul.f32 %v353_v13, %v349_v60 }
  0xc3   :  { %v296_v16 = vmul.f32 %v295_v14, %v289_v54  ;;  %v355_v17 = vadd.f32 -0.074975304, %v354_v15 }
  0xc5   :  { %v297_v4 = vadd.f32 0.1064488, %v296_v16  ;;  %v356_v20 = vmul.f32 %v355_v17, %v349_v60  ;;  %v1335_v17 = vmul.f32 %v1284_v59, %v1282_v57 }
  0xc7   :  { %v298_v7 = vmul.f32 %v297_v4, %v289_v54  ;;  %v357_v18 = vadd.f32 0.1064488, %v356_v20 }
  0xc9   :  { %v299_v22 = vadd.f32 -0.14207031, %v298_v7  ;;  %v358_v24 = vmul.f32 %v357_v18, %v349_v60 }
  0xca   :  { %v1092_v12 = vpop.eup %1091 }
  0xcb   :  { %v300_v9 = vmul.f32 %v299_v22, %v289_v54  ;;  %v414_v26 = vmul.f32 %v1092_v12, %v411_v10  ;;  %v359_v27 = vadd.f32 -0.14207031, %v358_v24 }
  0xcd   :  { %v301_v29 = vadd.f32 0.19993454, %v300_v9  ;;  %v415_v31 = vsub.f32 2.0, %v414_v26  ;;  %v360_v32 = vmul.f32 %v359_v27, %v349_v60 }
  0xcf   :  { %v302_v28 = vmul.f32 %v301_v29, %v289_v54  ;;  %v416_v39 = vmul.f32 %v1092_v12, %v415_v31  ;;  %v361_v34 = vadd.f32 0.19993454, %v360_v32 }
  0xd1   :  { %v303_v21 = vadd.f32 -0.33333147, %v302_v28  ;;  %v1293_v36 = vmul.f32 %v416_v39, %v412_v62  ;;  %v362_v43 = vmul.f32 %v361_v34, %v349_v60 }
  0xd3   :  { %v304_v25 = vmul.f32 %v303_v21, %v289_v54  ;;  %v363_v44 = vadd.f32 -0.33333147, %v362_v43 }
  0xd5   :  { %v305_v45 = vmul.f32 %v304_v25, %v288_v49  ;;  %v364_v46 = vmul.f32 %v363_v44, %v349_v60 }
  0xd7   :  { %v306_v40 = vadd.f32 %v305_v45, %v288_v49  ;;  %v365_v47 = vmul.f32 %v364_v46, %v348_v56  ;;  %v1117_v49 = vmov 0.0  }
  0xd8   :  { %v314_v52 = vsel %vm313_vm7, 3.1415927, %v1117_v49  ;;  %v374_v63 = vsel %vm373_vm15, 3.1415927, %v1117_v49  ;;  %vm375_vm7 = vcmp.eq.f32.partialorder %v1239_v38, 0.0 }
  0xd9   :  { %v308_v48 = vsub.f32 1.5707964, %v306_v40  ;;  %v366_v50 = vadd.f32 %v365_v47, %v348_v56  ;;  %v322_v56 = vsel %vm310_vm9, 2.3561945, %v1118_v58 }
  0xdb   :  { %v309_v51 = vsel %vm307_vm6, %v308_v48, %v306_v40  ;;  %v368_v54 = vsub.f32 1.5707964, %v366_v50  ;;  %vm383_vm6 = vcmp.eq.s32.totalorder %v1274_v42, inf }
  0xdc   :  { %v311_v53 = vsub.f32 3.1415927, %v309_v51 }
  0xdd   :  { %v369_v60 = vsel %vm367_vm13, %v368_v54, %v366_v50  ;;  %vm544_vm13 = vcmp.ne.f32.partialorder %v1335_v17, 0.0 }
  0xde   :  { %v312_v37 = vsel %vm310_vm9, %v311_v53, %v309_v51  ;;  %v371_v62 = vsub.f32 3.1415927, %v369_v60  ;;  %vm385_vm9 = vmand %vm383_vm6, %vm384_vm3  ;;  %vm427_vm3 = vcmp.eq.f32.partialorder %v1335_v17, 0.0 }
  0xdf   :  { %v316_v61 = vsel %vm315_vm14, %v314_v52, %v312_v37 }
  0xe0   :  { %v320_v0 = vsel %vm1309_vm0, nan, %v316_v61  ;;  %v372_v3 = vsel %vm370_vm5, %v371_v62, %v369_v60  ;;  %v1121_v60 = vmov 2131351028   ;;  %v1122_v62 = vmov 2102212464  }
  0xe1   :  { %v326_v30 = vsel %vm325_vm4, %v322_v56, %v320_v0  ;;  %v376_v5 = vsel %vm375_vm7, %v374_v63, %v372_v3  ;;  %v1120_v56 = vmov 2475754826   ;;  %v1123_v0 = vmov 920167782  }
  0xe2   :  { %v327_v35 = vand.u32 2147483647, %v326_v30  ;;  %v380_v42 = vsel %vm379_vm8, nan, %v376_v5 }
  0xe3   :  { %v386_v10 = vsel %vm385_vm9, %v382_v33, %v380_v42 }
  0xe4   :  { %v329_v8 = vor.u32 %v328_v2, %v327_v35  ;;  %v387_v11 = vand.u32 2147483647, %v386_v10 }
  0xe6   :  { %vm330_vm10 = vcmp.lt.f32.partialorder %v329_v8, 0.0  ;;  %v389_v14 = vor.u32 %v388_v6, %v387_v11  ;;  %v1124_v6 = vmov 1326507024  }
  0xe7   :  { %v331_v13 = vsel %vm330_vm10, 6.2831855, %v1117_v49 }
  0xe8   :  { %v332_v15 = vadd.f32 %v331_v13, %v329_v8  ;;  %vm390_vm11 = vcmp.lt.f32.partialorder %v389_v14, 0.0 }
  0xe9   :  { %v391_v19 = vsel %vm390_vm11, 6.2831855, %v1117_v49 }
  0xea   :  { %v392_v16 = vadd.f32 %v391_v19, %v389_v14 }
  0xec   :  { %v418_v41 = vsub.f32 %v392_v16, %v332_v15  ;;  %v419_v4 = vadd.f32 %v392_v16, %v332_v15 }
  0xee   :  { %vm421_vm12 = vcmp.gt.f32.partialorder %v418_v41, 3.1415927  ;;  %v981_v20 = vadd.f32 -6.2831855, %v418_v41  ;;  %v545_v38 = vand.u32 2147483647, %v418_v41 }
  0xef   :  { %vm424_vm14 = vcmp.lt.f32.partialorder %v418_v41, -3.1415927  ;;  %vm548_vm15 = vcmp.lt.f32.partialorder %v419_v4, 6.2831855  ;;  %v550_v18 = vadd.f32 6.2831855, %v419_v4 }
  0xf0   :  { %v423_v7 = vsel %vm421_vm12, %v981_v20, %v418_v41  ;;  %vm546_vm0 = vcmp.gt.f32.partialorder %v545_v38, 3.1415927  ;;  %vm552_vm1 = vcmp.ge.f32.partialorder %v419_v4, 6.2831855 }
  0xf1   :  { %v425_v22 = vadd.f32 6.2831855, %v423_v7  ;;  %vm547_vm2 = vmand %vm544_vm13, %vm546_vm0 }
  0xf2   :  { %vm549_vm4 = vmand %vm547_vm2, %vm548_vm15 }
  0xf3   :  { %v426_v12 = vsel %vm424_vm14, %v425_v22, %v423_v7  ;;  %v551_v59 = vsel %vm549_vm4, %v550_v18, %v419_v4  ;;  %vm553_vm5 = vmand %vm547_vm2, %vm552_vm1 }
  0xf4   :  { %v428_v57 = vsel %vm427_vm3, 0.0, %v426_v12  ;;  %v986_v9 = vadd.f32 -6.2831855, %v551_v59 }
  0xf5   :  { %v1339_v24 = vmul.f32 0.5, %v428_v57 }
  0xf6   :  { %v555_v29 = vsel %vm553_vm5, %v986_v9, %v551_v59 }
  0xf7   :  { %v439_v26 = vand.u32 2147483647, %v1339_v24  ;;  %v442_v27 = vand.u32 2139095040, %v1339_v24  ;;  %v556_v32 = vmul.f32 2.0, %v555_v29  ;;  %vm441_vm5 = vcmp.lt.s32.totalorder %v1339_v24, 0 }
  0xf9   :  { %v443_v31 = vshrl.u32 %v442_v27, 23  ;;  %v446_v28 = vand.u32 8388607, %v439_v26  ;;  %v557_v34 = vsel %vm427_vm3, %v556_v32, %v555_v29  ;;  %v1370_v27 = vadd.f32 1e-06, %v1335_v17 }
  0xfa   :  { %v1345_v21 = vmul.f32 0.5, %v557_v34 }
  0xfb   :  { %v982_v39 = vadd.s32 4294967169, %v443_v31  ;;  %v447_v25 = vor.u32 8388608, %v446_v28  ;;  %1093 = vrsqrt.f32 %v1370_v27  ;;  %vm432_vm2 = vcmp.eq.f32.partialorder %v1370_v27, inf }
  0xfc   :  { %v559_v44 = vand.u32 2147483647, %v1345_v21  ;;  %v562_v45 = vand.u32 2139095040, %v1345_v21  ;;  %v827_v46 = vmul.f32 57.29578, %v1345_v21  ;;  %vm434_vm4 = vcmp.eq.f32.partialorder %v1370_v27, 0.0 }
  0xfd   :  { %v449_v43 = vadd.s32 1, %v982_v39  ;;  %v1352_v49 = vshll.u32 %v447_v25, 8 }
  0xfe   :  { %v563_v47 = vshrl.u32 %v562_v45, 23  ;;  %v566_v48 = vand.u32 8388607, %v559_v44  ;;  %v998_v53 = vadd.f32 -275.0, %v827_v46 }
  0xff   :  { %vm450_vm6 = vcmp.gt.s32.totalorder %v449_v43, 0 }
 0x100   :  { %v451_v40 = vsel %vm450_vm6, %v449_v43, 0  ;;  %v987_v52 = vadd.s32 4294967169, %v563_v47  ;;  %v567_v30 = vor.u32 8388608, %v566_v48  ;;  %v829_v16 = vmul.f32 0.04, %v998_v53 }
 0x101   :  { %v452_v50 = vshrl.u32 %v451_v40, 5  ;;  %v453_v51 = vand.u32 31, %v451_v40  ;;  %v944_v40 = vmul.f32 %v1248_v23, %v1248_v23  ;;  %v945_v53 = vmul.f32 %v1293_v36, %v1293_v36 }
 0x102   :  { %v569_v14 = vadd.s32 1, %v987_v52  ;;  %v1384_v17 = vshll.u32 %v567_v30, 8  ;;  %v830_v46 = vmul.f32 %v829_v16, %v829_v16  ;;  %vm1454_vm6 = vcmp.le.f32.partialorder %v439_v26, 0.7853982 }
 0x103   :  { %v454_v54 = vsub.s32 32, %v453_v51  ;;  %v456_v58 = vshll.u32 %v1119_v55, %v453_v51  ;;  %v459_v37 = vshll.u32 %v1120_v56, %v453_v51  ;;  %v462_v61 = vshll.u32 %v1121_v60, %v453_v51 }
 0x104   :  { %v465_v63 = vshll.u32 %v1122_v62, %v453_v51  ;;  %v468_v2 = vshll.u32 %v1123_v0, %v453_v51  ;;  %vm471_vm7 = vcmp.lt.s32.totalorder %v452_v50, 1  ;;  %vm472_vm8 = vcmp.lt.s32.totalorder %v452_v50, 2 }
 0x105   :  { %v455_v3 = vshrl.u32 %v1119_v55, %v454_v54  ;;  %v457_v33 = vshrl.u32 %v1120_v56, %v454_v54  ;;  %v460_v35 = vshrl.u32 %v1121_v60, %v454_v54  ;;  %v463_v5 = vshrl.u32 %v1122_v62, %v454_v54 }
 0x106   :  { %v466_v42 = vshrl.u32 %v1123_v0, %v454_v54  ;;  %v469_v8 = vshrl.u32 %v1124_v6, %v454_v54  ;;  %vm474_vm9 = vcmp.lt.s32.totalorder %v452_v50, 4  ;;  %vm473_vm10 = vcmp.lt.s32.totalorder %v452_v50, 3 }
 0x107   :  { %v458_v10 = vor.u32 %v457_v33, %v456_v58  ;;  %v461_v11 = vor.u32 %v460_v35, %v459_v37  ;;  %v464_v13 = vor.u32 %v463_v5, %v462_v61  ;;  %vm570_vm11 = vcmp.gt.s32.totalorder %v569_v14, 0 }
 0x108   :  { %v467_v15 = vor.u32 %v466_v42, %v465_v63  ;;  %v470_v19 = vor.u32 %v469_v8, %v468_v2  ;;  %v571_v9 = vsel %vm570_vm11, %v569_v14, 0  ;;  %vm1487_vm11 = vcmp.le.f32.partialorder %v559_v44, 0.7853982 }
 0x109   :  { %v475_v41 = vsel %vm471_vm7, %v455_v3, %v458_v10  ;;  %v476_v4 = vsel %vm474_vm9, %v464_v13, 2102212464  ;;  %v479_v20 = vsel %vm471_vm7, %v458_v10, %v461_v11  ;;  %v483_v38 = vsel %vm471_vm7, %v461_v11, %v464_v13 }
 0x10a   :  { %v477_v7 = vsel %vm473_vm10, %v461_v11, %v476_v4  ;;  %v480_v18 = vsel %vm474_vm9, %v467_v15, 920167782  ;;  %v484_v22 = vsel %vm474_vm9, %v470_v19, 1326507024  ;;  %v572_v32 = vshrl.u32 %v571_v9, 5 }
 0x10b   :  { %v478_v12 = vsel %vm472_vm8, %v475_v41, %v477_v7  ;;  %v481_v57 = vsel %vm473_vm10, %v464_v13, %v480_v18  ;;  %v485_v59 = vsel %vm473_vm10, %v467_v15, %v484_v22  ;;  %v573_v45 = vand.u32 31, %v571_v9 }
 0x10c   :  { %v482_v29 = vsel %vm472_vm8, %v479_v20, %v481_v57  ;;  %v486_v31 = vsel %vm472_vm8, %v483_v38, %v485_v59  ;;  %v494_v25 = vmul.u32 %v1352_v49, %v478_v12  ;;  %vm591_vm12 = vcmp.lt.s32.totalorder %v572_v32, 1 }
 0x10d   :  { %v1375_v28 = vmul.u32.u64.low %v1352_v49, %v486_v31  ;;  %v1376_v39 = vmul.u32.u64.high %v1352_v49, %v486_v31, %v1375_v28  ;;  %v1379_v34 = vmul.u32.u64.low %v1352_v49, %v482_v29  ;;  %v1380_v43 = vmul.u32.u64.high %v1352_v49, %v482_v29, %v1379_v34 }
 0x10e   :  { %vm593_vm13 = vcmp.lt.s32.totalorder %v572_v32, 3  ;;  %vm594_vm14 = vcmp.lt.s32.totalorder %v572_v32, 4  ;;  %v574_v47 = vsub.s32 32, %v573_v45  ;;  %v576_v48 = vshll.u32 %v1119_v55, %v573_v45 }
 0x10f   :  { %v579_v50 = vshll.u32 %v1120_v56, %v573_v45  ;;  %v582_v51 = vshll.u32 %v1121_v60, %v573_v45  ;;  %vm496_vm15 = vc.u32 %v1376_v39, %v1379_v34  ;;  %v497_v49 = vadd.s32 1, %v1380_v43 }
 0x110   :  { %v585_v52 = vshll.u32 %v1122_v62, %v573_v45  ;;  %v575_v54 = vshrl.u32 %v1119_v55, %v574_v47  ;;  %v577_v23 = vshrl.u32 %v1120_v56, %v574_v47  ;;  %v580_v58 = vshrl.u32 %v1121_v60, %v574_v47 }
 0x111   :  { %v583_v37 = vshrl.u32 %v1122_v62, %v574_v47  ;;  %v498_v61 = vsel %vm496_vm15, %v497_v49, %v1380_v43  ;;  %v586_v63 = vshrl.u32 %v1123_v0, %v574_v47  ;;  %v588_v2 = vshll.u32 %v1123_v0, %v573_v45 }
 0x112   :  { %v589_v30 = vshrl.u32 %v1124_v6, %v574_v47  ;;  %v499_v3 = vadd.s32 %v498_v61, %v494_v25  ;;  %v578_v33 = vor.u32 %v577_v23, %v576_v48  ;;  %v581_v35 = vor.u32 %v580_v58, %v579_v50  ;;  %v1094_v48 = vpop.eup %1093 }
 0x113   :  { %v584_v5 = vor.u32 %v583_v37, %v582_v51  ;;  %v587_v42 = vor.u32 %v586_v63, %v585_v52  ;;  %v831_v10 = vsub.f32 0.0, %v830_v46  ;;  %v1405_v11 = vadd.f32 %v945_v53, %v944_v40 }
 0x114   :  { %v590_v8 = vor.u32 %v589_v30, %v588_v2  ;;  %v500_v13 = vadd.s32 536870912, %v499_v3  ;;  %vm592_vm0 = vcmp.lt.s32.totalorder %v572_v32, 2  ;;  %v599_v15 = vsel %vm591_vm12, %v578_v33, %v581_v35 }
 0x115   :  { %v596_v14 = vsel %vm594_vm14, %v584_v5, 2102212464  ;;  %v600_v19 = vsel %vm594_vm14, %v587_v42, 920167782  ;;  %v603_v16 = vsel %vm591_vm12, %v581_v35, %v584_v5  ;;  %v595_v20 = vsel %vm591_vm12, %v575_v54, %v578_v33 }
 0x116   :  { %v604_v41 = vsel %vm594_vm14, %v590_v8, 1326507024  ;;  %v501_v4 = vshrl.u32 %v500_v13, 30  ;;  %v601_v38 = vsel %vm593_vm13, %v584_v5, %v600_v19  ;;  %v597_v18 = vsel %vm593_vm13, %v581_v35, %v596_v14 }
 0x117   :  { %v605_v7 = vsel %vm593_vm13, %v587_v42, %v604_v41  ;;  %v602_v22 = vsel %vm592_vm0, %v599_v15, %v601_v38  ;;  %v832_v57 = vmul.f32 1.442695, %v831_v10  ;;  %v598_v25 = vsel %vm592_vm0, %v595_v20, %v597_v18 }
 0x118   :  { %v606_v12 = vsel %vm592_vm0, %v603_v16, %v605_v7  ;;  %v502_v59 = vshll.u32 %v501_v4, 30  ;;  %v1424_v31 = vmul.u32.u64.low %v1384_v17, %v602_v22  ;;  %v1425_v28 = vmul.u32.u64.high %v1384_v17, %v602_v22, %v1424_v31 }
 0x119   :  { %v1420_v9 = vmul.u32.u64.low %v1384_v17, %v606_v12  ;;  %v1421_v29 = vmul.u32.u64.high %v1384_v17, %v606_v12, %v1420_v9  ;;  %1095 = vpow2.f32 %v832_v57  ;;  %v614_v46 = vmul.u32 %v1384_v17, %v598_v25 }
 0x11a   :  { %v503_v43 = vsub.s32 %v499_v3, %v502_v59  ;;  %v617_v40 = vadd.s32 1, %v1425_v28  ;;  %v431_v54 = vmul.f32 %v1094_v48, %v1370_v27  ;;  %v495_v23 = vadd.s32 %v1379_v34, %v1376_v39 }
 0x11b   :  { %vm616_vm1 = vc.u32 %v1421_v29, %v1424_v31  ;;  %v525_v37 = vsub.s32 4, %v501_v4  ;;  %v808_v63 = vmul.f32 %v1290_v1, %v1290_v1  ;;  %v435_v34 = vand.u32 2147483648, %v1370_v27 }
 0x11c   :  { %v505_v45 = vsub.s32 0, %v503_v43  ;;  %v618_v50 = vsel %vm616_vm1, %v617_v40, %v1425_v28  ;;  %v433_v39 = vsel %vm432_vm2, %v1370_v27, %v431_v54  ;;  %vm561_vm7 = vcmp.lt.s32.totalorder %v1345_v21, 0 }
 0x11d   :  { %v619_v49 = vadd.s32 %v618_v50, %v614_v46  ;;  %v809_v10 = vmul.f32 %v808_v63, %v1290_v1  ;;  %v526_v19 = vsel %vm441_vm5, %v525_v37, %v501_v4  ;;  %v810_v16 = vmul.f32 %v808_v63, %v808_v63 }
 0x11e   :  { %v983_v47 = vmin.u32 %v505_v45, %v503_v43  ;;  %v436_v22 = vsel %vm434_vm4, %v435_v34, %v433_v39  ;;  %v528_v12 = vsel %vm1454_vm6, 0, %v526_v19  ;;  %vm531_vm14 = vweird.f32 %v1339_v24 }
 0x11f   :  { %v620_v32 = vadd.s32 536870912, %v619_v49  ;;  %v1462_v4 = vmul.f32 %v810_v16, %v809_v10  ;;  %v532_v25 = vadd.s32 3, %v528_v12  ;;  %v1465_v45 = vmul.f32 2.0, %v436_v22 }
 0x120   :  { %v507_v51 = vclz %v983_v47 }
 0x121   :  { %v621_v61 = vshrl.u32 %v620_v32, 30  ;;  %v1468_v48 = vadd.f32 6.1035156e+09, %v1462_v4 }
 0x122   :  { %v984_v52 = vadd.s32 4294967294, %v507_v51  ;;  %v615_v51 = vadd.s32 %v1424_v31, %v1421_v29 }
 0x123   :  { %v1096_v53 = vpop.eup %1095  ;;  %v622_v35 = vshll.u32 %v621_v61, 30  ;;  %v645_v27 = vsub.s32 4, %v621_v61 }
 0x124   :  { %vm985_vm3 = vcmp.lt.s32.totalorder %v984_v52, 0  ;;  %v834_v17 = vmul.f32 0.5235988, %v1096_v53 }
 0x125   :  { %v510_v58 = vsel %vm985_vm3, 0, %v984_v52  ;;  %v623_v8 = vsub.s32 %v619_v49, %v622_v35  ;;  %v1477_v52 = vand.u32 3, %v532_v25  ;;  %v646_v29 = vsel %vm561_vm7, %v645_v27, %v621_v61 }
 0x126   :  { %v511_v2 = vsub.s32 32, %v510_v58  ;;  %v512_v30 = vshll.u32 %v503_v43, %v510_v58  ;;  %v515_v3 = vsub.s32 4294967266, %v510_v58  ;;  %v1440_v33 = vmul.f32 2.0, %v834_v17 }
 0x127   :  { %v625_v41 = vsub.s32 0, %v623_v8  ;;  %vm538_vm10 = vcmp.eq.s32.totalorder %v1477_v52, 2  ;;  %vm535_vm12 = vcmp.eq.s32.totalorder %v1477_v52, 0  ;;  %vm534_vm13 = vcmp.lt.s32.totalorder %v1477_v52, 2 }
 0x128   :  { %v513_v5 = vshrl.u32 %v495_v23, %v511_v2  ;;  %v516_v42 = vadd.s32 127, %v515_v3  ;;  %v839_v13 = vand.u32 2139095040, %v1440_v33  ;;  %v836_v9 = vand.u32 2147483647, %v1440_v33 }
 0x129   :  { %v988_v57 = vmin.u32 %v625_v41, %v623_v8  ;;  %v648_v27 = vsel %vm1487_vm11, 0, %v646_v29 }
 0x12a   :  { %v514_v14 = vor.u32 %v513_v5, %v512_v30  ;;  %v517_v15 = vshll.u32 %v516_v42, 23  ;;  %v840_v20 = vshrl.u32 %v839_v13, 23  ;;  %v843_v50 = vand.u32 8388607, %v836_v9 }
 0x12b   :  { %v627_v43 = vclz %v988_v57 }
 0x12c   :  { %v518_v7 = vor.u32 4788187, %v517_v15  ;;  %v521_v18 = vcvt.s32.f32 %v514_v14  ;;  %v999_v28 = vadd.s32 4294967169, %v840_v20  ;;  %v844_v31 = vor.u32 8388608, %v843_v50 }
 0x12d   :  { %v989_v46 = vadd.s32 4294967294, %v627_v43 }
 0x12e   :  { %v519_v59 = vand.u32 2147483647, %v518_v7  ;;  %v846_v40 = vadd.s32 1, %v999_v28 }
 0x12f   :  { %vm990_vm8 = vcmp.lt.s32.totalorder %v989_v46, 0 }
 0x130   :  { %v522_v26 = vmul.f32 %v521_v18, %v519_v59  ;;  %vm847_vm9 = vcmp.gt.s32.totalorder %v846_v40, 0  ;;  %v630_v53 = vsel %vm990_vm8, 0, %v989_v46 }
 0x131   :  { %v848_v32 = vsel %vm847_vm9, %v846_v40, 0  ;;  %v631_v23 = vsub.s32 32, %v630_v53  ;;  %v632_v17 = vshll.u32 %v623_v8, %v630_v53  ;;  %v635_v58 = vsub.s32 4294967266, %v630_v53 }
 0x132   :  { %v523_v47 = vxor.u32 2147483648, %v522_v26  ;;  %v850_v37 = vand.u32 31, %v848_v32  ;;  %v849_v30 = vshrl.u32 %v848_v32, 5 }
 0x133   :  { %v633_v63 = vshrl.u32 %v615_v51, %v631_v23  ;;  %v636_v2 = vadd.s32 127, %v635_v58 }
 0x134   :  { %v524_v49 = vsel %vm441_vm5, %v523_v47, %v522_v26  ;;  %v851_v35 = vsub.s32 32, %v850_v37  ;;  %v853_v39 = vshll.u32 %v1119_v55, %v850_v37  ;;  %v856_v34 = vshll.u32 %v1120_v56, %v850_v37 }
 0x135   :  { %v527_v54 = vsel %vm1454_vm6, %v1339_v24, %v524_v49  ;;  %v859_v61 = vshll.u32 %v1121_v60, %v850_v37  ;;  %v634_v5 = vor.u32 %v633_v63, %v632_v17  ;;  %v637_v42 = vshll.u32 %v636_v2, 23 }
 0x136   :  { %1097 = vcosq.f32 %v527_v54  ;;  %v862_v8 = vshll.u32 %v1122_v62, %v850_v37  ;;  %v865_v10 = vshll.u32 %v1123_v0, %v850_v37  ;;  %v852_v44 = vshrl.u32 %v1119_v55, %v851_v35 }
 0x137   :  { %1099 = vsinq.f32 %v527_v54  ;;  %v854_v13 = vshrl.u32 %v1120_v56, %v851_v35  ;;  %v857_v14 = vshrl.u32 %v1121_v60, %v851_v35  ;;  %v860_v15 = vshrl.u32 %v1122_v62, %v851_v35 }
 0x138   :  { %v638_v19 = vor.u32 4788187, %v637_v42  ;;  %v641_v16 = vcvt.s32.f32 %v634_v5  ;;  %v863_v41 = vshrl.u32 %v1123_v0, %v851_v35  ;;  %v866_v20 = vshrl.u32 %v1124_v6, %v851_v35 }
 0x139   :  { %v855_v38 = vor.u32 %v854_v13, %v853_v39  ;;  %v858_v7 = vor.u32 %v857_v14, %v856_v34  ;;  %v861_v18 = vor.u32 %v860_v15, %v859_v61  ;;  %vm868_vm15 = vcmp.lt.s32.totalorder %v849_v30, 1 }
 0x13a   :  { %v639_v22 = vand.u32 2147483647, %v638_v19  ;;  %v864_v55 = vor.u32 %v863_v41, %v862_v8  ;;  %v867_v12 = vor.u32 %v866_v20, %v865_v10  ;;  %v884_v56 = vshll.u32 %v844_v31, 8 }
 0x13b   :  { %vm869_vm0 = vcmp.lt.s32.totalorder %v849_v30, 2  ;;  %vm870_vm1 = vcmp.lt.s32.totalorder %v849_v30, 3  ;;  %vm871_vm2 = vcmp.lt.s32.totalorder %v849_v30, 4  ;;  %v876_v60 = vsel %vm868_vm15, %v855_v38, %v858_v7 }
 0x13c   :  { %v642_v62 = vmul.f32 %v641_v16, %v639_v22  ;;  %v872_v57 = vsel %vm868_vm15, %v852_v44, %v855_v38  ;;  %v873_v59 = vsel %vm871_vm2, %v861_v18, 2102212464  ;;  %v877_v0 = vsel %vm871_vm2, %v864_v55, 920167782 }
 0x13d   :  { %v874_v6 = vsel %vm870_vm1, %v858_v7, %v873_v59  ;;  %v878_v43 = vsel %vm870_vm1, %v861_v18, %v877_v0  ;;  %v880_v26 = vsel %vm868_vm15, %v858_v7, %v861_v18  ;;  %v881_v25 = vsel %vm871_vm2, %v867_v12, 1326507024 }
 0x13e   :  { %v643_v47 = vxor.u32 2147483648, %v642_v62  ;;  %v879_v50 = vsel %vm869_vm0, %v876_v60, %v878_v43  ;;  %v882_v49 = vsel %vm870_vm1, %v864_v55, %v881_v25  ;;  %v875_v17 = vsel %vm869_vm0, %v872_v57, %v874_v6 }
 0x13f   :  { %v1514_v53 = vmul.u32.u64.low %v884_v56, %v879_v50  ;;  %v1515_v32 = vmul.u32.u64.high %v884_v56, %v879_v50, %v1514_v53  ;;  %v883_v58 = vsel %vm869_vm0, %v880_v26, %v882_v49  ;;  %v891_v30 = vmul.u32 %v884_v56, %v875_v17 }
 0x140   :  { %v1098_v28 = vpop.eup %1097  ;;  %v644_v23 = vsel %vm561_vm7, %v643_v47, %v642_v62  ;;  %v1529_v37 = vmul.u32.u64.low %v884_v56, %v883_v58  ;;  %v1530_v63 = vmul.u32.u64.high %v884_v56, %v883_v58, %v1529_v37  ;;  %v755_v61 = vadd.s32 3, %v648_v27 }
 0x141   :  { %v1100_v46 = vpop.eup %1099  ;;  %v539_v40 = vxor.u32 2147483648, %v1098_v28  ;;  %v647_v31 = vsel %vm1487_vm11, %v1345_v21, %v644_v23  ;;  %v894_v39 = vadd.s32 1, %v1515_v32  ;;  %v652_v5 = vand.u32 3, %v648_v27 }
 0x142   :  { %v536_v51 = vxor.u32 2147483648, %v1100_v46  ;;  %1101 = vcosq.f32 %v647_v31  ;;  %vm893_vm3 = vc.u32 %v1530_v63, %v1514_v53  ;;  %v756_v42 = vand.u32 3, %v755_v61 }
 0x143   :  { %v540_v54 = vsel %vm538_vm10, %v539_v40, %v1100_v46  ;;  %1103 = vsinq.f32 %v647_v31  ;;  %v895_v52 = vsel %vm893_vm3, %v894_v39, %v1515_v32  ;;  %vm657_vm4 = vcmp.eq.s32.totalorder %v652_v5, 2 }
 0x144   :  { %v537_v29 = vsel %vm535_vm12, %v1098_v28, %v536_v51  ;;  %1105 = vrcp.f32 %v1468_v48  ;;  %v896_v3 = vadd.s32 %v895_v52, %v891_v30  ;;  %vm761_vm5 = vcmp.eq.s32.totalorder %v756_v42, 2 }
 0x145   :  { %v541_v2 = vsel %vm534_vm13, %v537_v29, %v540_v54  ;;  %vm654_vm6 = vcmp.eq.s32.totalorder %v652_v5, 0  ;;  %vm758_vm7 = vcmp.eq.s32.totalorder %v756_v42, 0  ;;  %vm653_vm8 = vcmp.lt.s32.totalorder %v652_v5, 2 }
 0x146   :  { %v542_v35 = vsel %vm531_vm14, nan, %v541_v2  ;;  %v897_v24 = vadd.s32 536870912, %v896_v3  ;;  %vm757_vm9 = vcmp.lt.s32.totalorder %v756_v42, 2  ;;  %vm651_vm10 = vweird.f32 %v1345_v21 }
 0x147   :  { %v1538_v34 = vmul.f32 %v542_v35, %v1465_v45  ;;  %v892_v30 = vadd.s32 %v1514_v53, %v1530_v63  ;;  %v800_v63 = vmul.f32 0.015, %v1290_v1  ;;  %vm838_vm12 = vcmp.lt.s32.totalorder %v1440_v33, 0 }
 0x148   :  { %v1544_v8 = vshrl.u32 %v897_v24, 30  ;;  %vm837_vm13 = vcmp.le.f32.partialorder %v836_v9, 0.7853982  ;;  %vm928_vm3 = vweird.f32 %v1440_v33 }
 0x14a   :  { %v899_v13 = vshll.u32 %v1544_v8, 30 }
 0x14c   :  { %v1102_v10 = vpop.eup %1101  ;;  %v900_v41 = vsub.s32 %v896_v3, %v899_v13 }
 0x14d   :  { %v1104_v44 = vpop.eup %1103  ;;  %v658_v45 = vxor.u32 2147483648, %v1102_v10 }
 0x14e   :  { %v655_v14 = vxor.u32 2147483648, %v1104_v44  ;;  %v1106_v15 = vpop.eup %1105  ;;  %v902_v22 = vsub.s32 0, %v900_v41 }
 0x14f   :  { %v659_v19 = vsel %vm657_vm4, %v658_v45, %v1104_v44  ;;  %v763_v16 = vsel %vm761_vm5, %v658_v45, %v1104_v44  ;;  %v814_v56 = vmul.f32 %v1106_v15, %v1468_v48 }
 0x150   :  { %v656_v20 = vsel %vm654_vm6, %v1102_v10, %v655_v14  ;;  %v760_v38 = vsel %vm758_vm7, %v1102_v10, %v655_v14  ;;  %v1000_v28 = vmin.u32 %v902_v22, %v900_v41 }
 0x151   :  { %v660_v7 = vsel %vm653_vm8, %v656_v20, %v659_v19  ;;  %v764_v18 = vsel %vm757_vm9, %v760_v38, %v763_v16  ;;  %v815_v46 = vsub.f32 2.0, %v814_v56 }
 0x152   :  { %v661_v55 = vsel %vm651_vm10, nan, %v660_v7  ;;  %v765_v12 = vsel %vm651_vm10, nan, %v764_v18  ;;  %v904_v40 = vclz %v1000_v28 }
 0x153   :  { %v766_v60 = vmul.f32 %v661_v55, %v661_v55  ;;  %v767_v62 = vmul.f32 %v765_v12, %v765_v12  ;;  %v770_v57 = vmul.f32 2.0, %v765_v12  ;;  %v783_v59 = vmul.f32 0.8660254, %v661_v55 }
 0x154   :  { %v784_v0 = vmul.f32 0.5, %v765_v12  ;;  %v1001_v32 = vadd.s32 4294967294, %v904_v40  ;;  %v816_v31 = vmul.f32 %v1106_v15, %v815_v46 }
 0x155   :  { %v768_v6 = vmul.f32 2.0, %v766_v60  ;;  %v771_v21 = vmul.f32 %v770_v57, %v661_v55  ;;  %v772_v43 = vmul.f32 4.0, %v766_v60  ;;  %v775_v26 = vmul.f32 4.0, %v767_v62 }
 0x156   :  { %v785_v25 = vadd.f32 %v784_v0, %v783_v59  ;;  %vm1002_vm11 = vcmp.lt.s32.totalorder %v1001_v32, 0  ;;  %v817_v10 = vmul.f32 %v816_v31, %v1462_v4  ;;  %v922_v4 = vsub.s32 4, %v1544_v8 }
 0x157   :  { %v995_v47 = vadd.f32 -1.0, %v768_v6  ;;  %v996_v27 = vadd.f32 -3.0, %v772_v43  ;;  %v776_v50 = vsub.f32 3.0, %v775_v26  ;;  %v781_v51 = vmul.f32 2.0, %v771_v21 }
 0x158   :  { %v786_v49 = vmul.f32 0.17, %v785_v25  ;;  %v907_v52 = vsel %vm1002_vm11, 0, %v1001_v32  ;;  %v818_v38 = vadd.f32 1e-06, %v817_v10  ;;  %v923_v57 = vsel %vm838_vm12, %v922_v4, %v1544_v8 }
 0x159   :  { %v774_v48 = vmul.f32 %v996_v27, %v661_v55  ;;  %v777_v54 = vmul.f32 %v776_v50, %v765_v12  ;;  %v778_v23 = vmul.f32 2.0, %v995_v47  ;;  %v782_v17 = vmul.f32 %v995_v47, %v781_v51 }
 0x15a   :  { %v787_v58 = vsub.f32 1.0, %v786_v49  ;;  %v788_v29 = vmul.f32 0.24, %v995_v47  ;;  %v908_v42 = vsub.s32 32, %v907_v52  ;;  %v909_v24 = vshll.u32 %v900_v41, %v907_v52 }
 0x15b   :  { %v779_v37 = vmul.f32 %v995_v47, %v778_v23  ;;  %v790_v2 = vmul.f32 0.9945219, %v774_v48  ;;  %v791_v35 = vmul.f32 0.104528464, %v777_v54  ;;  %v796_v61 = vmul.f32 0.8910065, %v782_v17 }
 0x15c   :  { %v789_v39 = vadd.f32 %v788_v29, %v787_v58  ;;  %v912_v44 = vsub.s32 4294967266, %v907_v52  ;;  %v910_v14 = vshrl.u32 %v892_v30, %v908_v42  ;;  %1107 = vrsqrt.f32 %v818_v38 }
 0x15d   :  { %v997_v3 = vadd.f32 -1.0, %v779_v37  ;;  %v792_v5 = vsub.f32 %v790_v2, %v791_v35  ;;  %v925_v0 = vsel %vm837_vm13, 0, %v923_v57  ;;  %vm821_vm14 = vcmp.eq.f32.partialorder %v818_v38, inf }
 0x15e   :  { %v913_v15 = vadd.s32 127, %v912_v44  ;;  %v911_v20 = vor.u32 %v910_v14, %v909_v24  ;;  %v929_v6 = vadd.s32 3, %v925_v0  ;;  %v824_v46 = vand.u32 2147483648, %v818_v38 }
 0x15f   :  { %v793_v45 = vmul.f32 0.32, %v792_v5  ;;  %v795_v13 = vmul.f32 0.4539905, %v997_v3  ;;  %vm823_vm15 = vcmp.eq.f32.partialorder %v818_v38, 0.0 }
 0x160   :  { %v914_v7 = vshll.u32 %v913_v15, 23  ;;  %v918_v22 = vcvt.s32.f32 %v911_v20  ;;  %v930_v43 = vand.u32 3, %v929_v6 }
 0x161   :  { %v794_v19 = vadd.f32 %v793_v45, %v789_v39  ;;  %v797_v16 = vadd.f32 %v796_v61, %v795_v13  ;;  %v38_v39 = vlaneseq }
 0x162   :  { %v915_v18 = vor.u32 4788187, %v914_v7  ;;  %vm935_vm0 = vcmp.eq.s32.totalorder %v930_v43, 2  ;;  %vm932_vm1 = vcmp.eq.s32.totalorder %v930_v43, 0  ;;  %vm931_vm2 = vcmp.lt.s32.totalorder %v930_v43, 2 }
 0x163   :  { %v798_v53 = vmul.f32 0.2, %v797_v16  ;;  %v39_v3 = vshrl.u32 %v38_v39, 7  ;;  %v42_v5 = vand.u32 127, %v38_v39 }
 0x164   :  { %v916_v41 = vand.u32 2147483647, %v915_v18 }
 0x165   :  { %v799_v55 = vsub.f32 %v794_v19, %v798_v53 }
 0x166   :  { %v919_v56 = vmul.f32 %v918_v22, %v916_v41  ;;  %v1108_v28 = vpop.eup %1107 }
 0x167   :  { %v801_v12 = vmul.f32 %v800_v63, %v799_v55  ;;  %v820_v21 = vmul.f32 %v1108_v28, %v818_v38 }
 0x168   :  { %v920_v62 = vxor.u32 2147483648, %v919_v56 }
 0x169   :  { %v802_v60 = vadd.f32 1.0, %v801_v12  ;;  %v822_v40 = vsel %vm821_vm14, %v818_v38, %v820_v21 }
 0x16a   :  { %v921_v1 = vsel %vm838_vm12, %v920_v62, %v919_v56  ;;  %v825_v51 = vsel %vm823_vm15, %v824_v46, %v822_v40 }
 0x16b   :  { %1109 = vrcp.f32 %v802_v60  ;;  %v924_v59 = vsel %vm837_vm13, %v1440_v33, %v921_v1  ;;  %v826_v23 = vmul.f32 2.0, %v825_v51  ;;  %v40_v33 = vmul.u32 128, %v39_v3 }
 0x16c   :  { %1111 = vcosq.f32 %v924_v59 }
 0x16d   :  { %1113 = vsinq.f32 %v924_v59 }
 0x175   :  { %v1110_v26 = vpop.eup %1109 }
 0x176   :  { %v804_v25 = vmul.f32 %v1110_v26, %v802_v60  ;;  %v1112_v9 = vpop.eup %1111 }
 0x177   :  { %v1114_v8 = vpop.eup %1113  ;;  %v936_v27 = vxor.u32 2147483648, %v1112_v9 }
 0x178   :  { %v805_v47 = vsub.f32 2.0, %v804_v25  ;;  %v933_v49 = vxor.u32 2147483648, %v1114_v8 }
 0x179   :  { %v937_v32 = vsel %vm935_vm0, %v936_v27, %v1114_v8 }
 0x17a   :  { %v806_v50 = vmul.f32 %v1110_v26, %v805_v47  ;;  %v934_v54 = vsel %vm932_vm1, %v1112_v9, %v933_v49 }
 0x17b   :  { %v938_v17 = vsel %vm931_vm2, %v934_v54, %v937_v32 }
 0x17c   :  { %v807_v48 = vmul.f32 %v806_v50, %v1538_v34  ;;  %v939_v58 = vsel %vm928_vm3, nan, %v938_v17  ;;  %v43_v34 = vadd.s32 %v42_v5, %v40_v33 }
 0x17d   :  { %v940_v31 = vsub.f32 0.0, %v939_v58 }
 0x17e   :  { %v947_v29 = vmul.f32 %v807_v48, %v807_v48  ;;  %vm962_vm6 = vcmp.lt.s32.totalorder %v43_v34, 256 }
 0x17f   :  { %v941_v2 = vmul.f32 %v940_v31, %v826_v23 }
 0x180   :  { %v948_v37 = vadd.f32 %v947_v29, %v1405_v11 }
 0x181   :  { %v942_v35 = vmul.f32 %v941_v2, %v1293_v36 }
 0x183   :  { %v943_v30 = vmul.f32 %v942_v35, %v807_v48 }
 0x185   :  { %v949_v61 = vadd.f32 %v948_v37, %v943_v30 }
 0x187   :  { %v950_v52 = vmax.f32 %v949_v61, 0.0 }
 0x189   :  { %1115 = vrsqrt.f32 %v950_v52  ;;  %vm953_vm4 = vcmp.eq.f32.partialorder %v950_v52, inf  ;;  %v956_v24 = vand.u32 2147483648, %v950_v52  ;;  %vm955_vm5 = vcmp.eq.f32.partialorder %v950_v52, 0.0 }
 0x193   :  { %v1116_v42 = vpop.eup %1115 }
 0x194   :  { %v952_v10 = vmul.f32 %v1116_v42, %v950_v52 }
 0x196   :  { %v954_v44 = vsel %vm953_vm4, %v950_v52, %v952_v10 }
 0x197   :  { %v957_v11 = vsel %vm955_vm5, %v956_v24, %v954_v44 }
 0x198   :  { %v963_v45 = vsel %vm962_vm6, %v957_v11, 0.0 }
 0x199   :  { %965 = vst [vmem:[%s1568_s2] sm:$0xff] %v963_v45 }

</bundles_post_ra>
